<compile_context>
chip_gen: v6e
topology: v6e:2x2x1
jax: 0.10.0
libtpu: 0.0.40
codegen_flags: <defaults>
</compile_context>

<pallas_src>
import functools

import jax
import jax.numpy as jnp
from jax import lax
from jax.experimental import pallas as pl
from jax.experimental.pallas import tpu as pltpu

DILATIONS = (6, 12, 18)


def _tap_shifts():
    """Static (dy, dx) shifts of the 24 non-center dilated-conv taps."""
    shifts = []
    for d in DILATIONS:
        for ky in range(3):
            for kx in range(3):
                if ky == 1 and kx == 1:
                    continue
                shifts.append(((ky - 1) * d, (kx - 1) * d))
    return tuple(shifts)


def _fold_params(params):
    """Fold the output 1x1 conv into every branch; fuse all biases.

    Returns (blocks, wm_lhs, bias):
      blocks[0]   : merged-center weight (Cout, Cin)   (1x1 branch + center taps)
      blocks[1:]  : 24 non-center tap weights (Cout, Cin), DILATIONS-major order
      wm_lhs      : folded global-mean branch weight (Cout, Cin), f32
      bias        : fused bias (Cout, 1), f32
    """
    wo = params["wo"]                                      # (5, Cout, Cout)
    wm_f = params["wm"] @ wo[0]                            # (Cin, Cout)
    w1_f = params["w1"] @ wo[1]
    w6_f = jnp.einsum("yxio,op->yxip", params["w6"], wo[2])
    w12_f = jnp.einsum("yxio,op->yxip", params["w12"], wo[3])
    w18_f = jnp.einsum("yxio,op->yxip", params["w18"], wo[4])

    # Center taps of every dilation coincide with the 1x1 branch.
    center = w1_f + w6_f[1, 1] + w12_f[1, 1] + w18_f[1, 1]

    blocks = [center.T]                                    # (Cout, Cin) blocks
    for wf in (w6_f, w12_f, w18_f):                        # order == DILATIONS
        for ky in range(3):
            for kx in range(3):
                if ky == 1 and kx == 1:
                    continue
                blocks.append(wf[ky, kx].T)

    b_f = (params["bo"] + params["bm"] @ wo[0] + params["b1"] @ wo[1]
           + params["b6"] @ wo[2] + params["b12"] @ wo[3]
           + params["b18"] @ wo[4])                        # (1, Cout)
    return blocks, wm_f.T.astype(jnp.float32), b_f.T.astype(jnp.float32)


def _boundary_masks(H, W, HWp, shifts):
    """{0,1} validity mask per tap shift, shape (T, 1, HWp), zero in the pad."""
    HW = H * W
    ys = jnp.arange(H).reshape(H, 1)
    xs = jnp.arange(W).reshape(1, W)
    rows = []
    for sy, sx in shifts:
        valid = ((ys + sy >= 0) & (ys + sy < H)
                 & (xs + sx >= 0) & (xs + sx < W))
        row = valid.reshape(HW).astype(jnp.float32)
        rows.append(jnp.pad(row, (0, HWp - HW)))
    return jnp.stack(rows, axis=0).reshape(len(shifts), 1, HWp)


def _const_spec(shape, single_buffer=True):
    """BlockSpec for a grid-invariant operand; single-buffered when possible."""
    index_map = lambda n: (0,) * len(shape)
    if single_buffer:
        try:
            return pl.BlockSpec(shape, index_map, pipeline_mode=pl.Buffered(1))
        except Exception:      # older Pallas without pipeline_mode / Buffered
            pass
    return pl.BlockSpec(shape, index_map)


def _aspp_stack_kernel(x_ref, wc_ref, wt_ref, wm_ref, mask_ref, b_ref, o_ref,
                       stack_ref, *, W, HW, Cin, shifts, mxu_dtype):
    """Deep-K variant (tiny Cin): im2col stack of the 24 non-center taps."""
    HWp = x_ref.shape[-1]
    xf = x_ref[0].astype(jnp.float32)          # (Cin, HWp): rolls / mean in f32
    xc = xf.astype(mxu_dtype)                  # MXU operand for the center tap

    # Each dilated tap is a lane roll of the flat image (XLU slot, overlaps the
    # MXU) zeroed by a precomputed boundary mask row.
    for t, (sy, sx) in enumerate(shifts):
        flat = sy * W + sx
        rolled = pltpu.roll(xf, shift=(-flat) % HWp, axis=1)
        win = rolled * mask_ref[t]                                 # (Cin, HWp)
        stack_ref[pl.ds(t * Cin, Cin), :] = win.astype(stack_ref.dtype)

    # bf16 MXU: merged-center matmul on the resident image + one deep
    # contraction over the 24 stacked taps.
    acc = jnp.dot(wc_ref[...], xc, preferred_element_type=jnp.float32)
    acc = acc + jnp.dot(wt_ref[...], stack_ref[...].astype(mxu_dtype),
                        preferred_element_type=jnp.float32)

    # Image-features branch + fused bias as one rank-1 constant (f32).
    gmean = jnp.sum(xf, axis=1, keepdims=True) * (1.0 / HW)        # (Cin, 1)
    const = jnp.dot(wm_ref[...], gmean,
                    preferred_element_type=jnp.float32) + b_ref[...]
    o_ref[0] = (acc + const).astype(o_ref.dtype)


def _aspp_pertap_kernel(x_ref, wc_ref, wt_ref, wm_ref, mask_ref, b_ref, o_ref,
                        *, W, HW, shifts, mxu_dtype):
    """Per-tap accumulation variant (production Cin): no im2col scratch."""
    HWp = x_ref.shape[-1]
    xf = x_ref[0].astype(jnp.float32)
    xc = xf.astype(mxu_dtype)

    acc = jnp.dot(wc_ref[...], xc, preferred_element_type=jnp.float32)
    for t, (sy, sx) in enumerate(shifts):
        flat = sy * W + sx
        rolled = pltpu.roll(xf, shift=(-flat) % HWp, axis=1)
        win = (rolled * mask_ref[t]).astype(mxu_dtype)
        acc = acc + jnp.dot(wt_ref[t], win, preferred_element_type=jnp.float32)

    gmean = jnp.sum(xf, axis=1, keepdims=True) * (1.0 / HW)
    const = jnp.dot(wm_ref[...], gmean,
                    preferred_element_type=jnp.float32) + b_ref[...]
    o_ref[0] = (acc + const).astype(o_ref.dtype)


def aspp_pallas(x_nchw, params, *, mxu_dtype=jnp.bfloat16, use_stack=None):
    N, Cin, H, W = x_nchw.shape
    Cout = params["b1"].shape[-1]
    HW = H * W
    HWp = ((HW + 127) // 128) * 128            # lane-dense flat spatial axis
    shifts = _tap_shifts()
    T = len(shifts)                            # 24 non-center taps
    assert T % 2 == 0

    if use_stack is None:
        # Deep-K stack only for tiny Cin; per-tap otherwise (no 24*Cin*HW
        # scratch -> fits v7x 64 MiB VMEM, no stack vst traffic on v5e).
        use_stack = Cin <= 64

    x2 = x_nchw.reshape(N, Cin, HW)            # free reshape (NCHW kept)
    if HWp != HW:
        x2 = jnp.pad(x2, ((0, 0), (0, 0), (0, HWp - HW)))

    blocks, wm_lhs, bias = _fold_params(params)
    w_center = blocks[0].astype(mxu_dtype)                              # (Cout, Cin)
    if use_stack:
        w_taps = jnp.concatenate(blocks[1:], axis=1).astype(mxu_dtype)  # (Cout, T*Cin)
    else:
        w_taps = jnp.stack(blocks[1:], axis=0).astype(mxu_dtype)        # (T, Cout, Cin)
    masks = _boundary_masks(H, W, HWp, shifts)                          # (T, 1, HWp) f32

    if use_stack:
        # bf16 stack only when Cin keeps every store packed-tile aligned;
        # otherwise f32 stores + operand cast at the dot (MXU still bf16).
        stack_dtype = mxu_dtype if Cin % 16 == 0 else jnp.float32
        kernel = functools.partial(_aspp_stack_kernel, W=W, HW=HW, Cin=Cin,
                                   shifts=shifts, mxu_dtype=mxu_dtype)
        scratch = [pltpu.VMEM((T * Cin, HWp), stack_dtype)]
    else:
        kernel = functools.partial(_aspp_pertap_kernel, W=W, HW=HW,
                                   shifts=shifts, mxu_dtype=mxu_dtype)
        scratch = []

    cost = pl.CostEstimate(
        flops=2 * N * Cout * (T + 1) * Cin * HW,
        transcendentals=0,
        bytes_accessed=(x2.size * x2.dtype.itemsize
                        + w_center.size * w_center.dtype.itemsize
                        + w_taps.size * w_taps.dtype.itemsize
                        + wm_lhs.size * 4 + bias.size * 4 + masks.size * 4
                        + N * Cout * HWp * x_nchw.dtype.itemsize))

    def _run(single_buffer_consts):
        cs = functools.partial(_const_spec, single_buffer=single_buffer_consts)
        return pl.pallas_call(
            kernel,
            out_shape=jax.ShapeDtypeStruct((N, Cout, HWp), x_nchw.dtype),
            grid_spec=pltpu.PrefetchScalarGridSpec(
                num_scalar_prefetch=0,
                grid=(N,),
                in_specs=[
                    pl.BlockSpec((1, Cin, HWp), lambda n: (n, 0, 0)),  # image
                    cs(w_center.shape),                                # merged center
                    cs(w_taps.shape),                                  # dilated taps
                    cs(wm_lhs.shape),                                  # mean branch
                    cs(masks.shape),                                   # tap masks
                    cs(bias.shape),                                    # fused bias
                ],
                out_specs=pl.BlockSpec((1, Cout, HWp), lambda n: (n, 0, 0)),
                scratch_shapes=scratch,
            ),
            compiler_params=pltpu.CompilerParams(
                dimension_semantics=("parallel",)),
            cost_estimate=cost,
        )(x2, w_center, w_taps, wm_lhs, masks, bias)

    try:
        out = _run(True)           # single-buffer the grid-invariant operands
    except Exception:              # conservative fallback if Buffered(1) rejected
        out = _run(False)

    out = out[:, :, :HW]                                   # drop lane padding
    return out.reshape(N, Cout, H, W)                      # free reshape to NCHW


def aspp_reference(x_nchw, params):
    """Pure-JAX reference mirroring the PyTorch forward."""
    x = jnp.transpose(x_nchw, (0, 2, 3, 1))
    N, H, W, Cin = x.shape
    Cout = params["b1"].shape[-1]

    pooled = jnp.mean(x, axis=(1, 2), keepdims=True)                   # (N,1,1,Cin)
    gf = jnp.einsum("nhwc,co->nhwo", pooled, params["wm"]) + params["bm"]
    gf = jnp.broadcast_to(gf, (N, H, W, Cout))                         # bilinear of 1x1
    a1 = jnp.einsum("nhwc,co->nhwo", x, params["w1"]) + params["b1"]

    def dil(w, b, d):
        y = lax.conv_general_dilated(
            x, w, window_strides=(1, 1), padding=((d, d), (d, d)),
            rhs_dilation=(d, d), dimension_numbers=("NHWC", "HWIO", "NHWC"))
        return y + b

    a6 = dil(params["w6"], params["b6"], 6)
    a12 = dil(params["w12"], params["b12"], 12)
    a18 = dil(params["w18"], params["b18"], 18)

    wo = params["wo"]
    out = (jnp.einsum("nhwc,co->nhwo", gf, wo[0])
           + jnp.einsum("nhwc,co->nhwo", a1, wo[1])
           + jnp.einsum("nhwc,co->nhwo", a6, wo[2])
           + jnp.einsum("nhwc,co->nhwo", a12, wo[3])
           + jnp.einsum("nhwc,co->nhwo", a18, wo[4])
           + params["bo"])
    return jnp.transpose(out, (0, 3, 1, 2))


if __name__ == "__main__":
    N, Cin, Cout, H, W = 2, 8, 8, 16, 16

    key = jax.random.PRNGKey(0)
    keys = jax.random.split(key, 13)
    init = lambda k, s: 0.1 * jax.random.normal(k, s, jnp.float32)
    params = dict(
        wm=init(keys[0], (Cin, Cout)),  bm=init(keys[1], (1, Cout)),
        w1=init(keys[2], (Cin, Cout)),  b1=init(keys[3], (1, Cout)),
        w6=init(keys[4], (3, 3, Cin, Cout)),  b6=init(keys[5], (1, Cout)),
        w12=init(keys[6], (3, 3, Cin, Cout)), b12=init(keys[7], (1, Cout)),
        w18=init(keys[8], (3, 3, Cin, Cout)), b18=init(keys[9], (1, Cout)),
        wo=init(keys[10], (5, Cout, Cout)),   bo=init(keys[11], (1, Cout)),
    )
    x = jax.random.normal(keys[12], (N, Cin, H, W), jnp.float32)

    ref = jax.block_until_ready(aspp_reference(x, params))

    # Default path at this Cin: deep-K im2col stack, bf16 MXU.
    out_stack = jax.block_until_ready(aspp_pallas(x, params))
    assert out_stack.shape == (N, Cout, H, W), out_stack.shape

    # Production-shape path (per-tap accumulation, no im2col scratch),
    # exercised here at the demo shape as well.
    out_pertap = jax.block_until_ready(aspp_pallas(x, params, use_stack=False))
    assert out_pertap.shape == (N, Cout, H, W), out_pertap.shape

    tol = 3e-2   # bf16 MXU vs. f32 reference
    err_stack = float(jnp.max(jnp.abs(out_stack - ref)))
    err_pertap = float(jnp.max(jnp.abs(out_pertap - ref)))
    assert err_stack < tol, f"stack-path max abs error vs reference: {err_stack}"
    assert err_pertap < tol, f"per-tap-path max abs error vs reference: {err_pertap}"
    print("KERNEL_OK")
</pallas_src>

<mosaic_0001>
module attributes {stable_mosaic.version = 11 : i64} {
  func.func @_aspp_stack_kernel(%arg0: i32, %arg1: memref<1x8x256xf32, #tpu.memory_space<vmem>>, %arg2: memref<8x8xbf16, #tpu.memory_space<vmem>>, %arg3: memref<8x192xbf16, #tpu.memory_space<vmem>>, %arg4: memref<8x8xf32, #tpu.memory_space<vmem>>, %arg5: memref<24x1x256xf32, #tpu.memory_space<vmem>>, %arg6: memref<8x1xf32, #tpu.memory_space<vmem>>, %arg7: memref<1x8x256xf32, #tpu.memory_space<vmem>>, %arg8: memref<192x256xf32, #tpu.memory_space<vmem>>) attributes {dimension_semantics = [#tpu.dimension_semantics<parallel>], iteration_bounds = array<i64: 2>, scalar_prefetch = 0 : i64, scratch_operands = 1 : i64, tpu.core_type = #tpu.core_type<tc>, window_params = [{transform_indices = @transform_0, window_bounds = array<i64: 1, 8, 256>}, {pipeline_mode = #tpu.pipeline_mode<synchronous>, transform_indices = @transform_1, window_bounds = array<i64: 8, 8>}, {pipeline_mode = #tpu.pipeline_mode<synchronous>, transform_indices = @transform_2, window_bounds = array<i64: 8, 192>}, {pipeline_mode = #tpu.pipeline_mode<synchronous>, transform_indices = @transform_3, window_bounds = array<i64: 8, 8>}, {pipeline_mode = #tpu.pipeline_mode<synchronous>, transform_indices = @transform_4, window_bounds = array<i64: 24, 1, 256>}, {pipeline_mode = #tpu.pipeline_mode<synchronous>, transform_indices = @transform_5, window_bounds = array<i64: 8, 1>}, {transform_indices = @transform_6, window_bounds = array<i64: 1, 8, 256>}]} {
    %c0 = arith.constant 0 : index
    %c0_0 = arith.constant 0 : index
    %c0_1 = arith.constant 0 : index
    %0 = vector.load %arg1[%c0, %c0_0, %c0_1] : memref<1x8x256xf32, #tpu.memory_space<vmem>>, vector<1x8x256xf32>
    %1 = vector.shape_cast %0 : vector<1x8x256xf32> to vector<8x256xf32>
    %2 = arith.truncf %1 : vector<8x256xf32> to vector<8x256xbf16>
    %c102_i32 = arith.constant 102 : i32
    %3 = tpu.dynamic_rotate %1 by %c102_i32 dim 1 : vector<8x256xf32>, i32 -> vector<8x256xf32>
    %c0_2 = arith.constant 0 : index
    %c0_3 = arith.constant 0 : index
    %c0_4 = arith.constant 0 : index
    %4 = vector.load %arg5[%c0_2, %c0_3, %c0_4] : memref<24x1x256xf32, #tpu.memory_space<vmem>>, vector<1x1x256xf32>
    %5 = vector.shape_cast %4 : vector<1x1x256xf32> to vector<1x256xf32>
    %6 = vector.broadcast %5 : vector<1x256xf32> to vector<8x256xf32>
    %7 = arith.mulf %3, %6 : vector<8x256xf32>
    %c0_5 = arith.constant 0 : index
    %c0_6 = arith.constant 0 : index
    %8 = vector.load %arg8[%c0_5, %c0_6] : memref<192x256xf32, #tpu.memory_space<vmem>>, vector<8x256xf32>
    tpu.vector_store %arg8[%c0_5, %c0_6], %7 {strides = array<i32>} : memref<192x256xf32, #tpu.memory_space<vmem>>, vector<8x256xf32>,
    %c96_i32 = arith.constant 96 : i32
    %9 = tpu.dynamic_rotate %1 by %c96_i32 dim 1 : vector<8x256xf32>, i32 -> vector<8x256xf32>
    %c1 = arith.constant 1 : index
    %c0_7 = arith.constant 0 : index
    %c0_8 = arith.constant 0 : index
    %10 = vector.load %arg5[%c1, %c0_7, %c0_8] : memref<24x1x256xf32, #tpu.memory_space<vmem>>, vector<1x1x256xf32>
    %11 = vector.shape_cast %10 : vector<1x1x256xf32> to vector<1x256xf32>
    %12 = vector.broadcast %11 : vector<1x256xf32> to vector<8x256xf32>
    %13 = arith.mulf %9, %12 : vector<8x256xf32>
    %c8 = arith.constant 8 : index
    %c0_9 = arith.constant 0 : index
    %14 = vector.load %arg8[%c8, %c0_9] : memref<192x256xf32, #tpu.memory_space<vmem>>, vector<8x256xf32>
    tpu.vector_store %arg8[%c8, %c0_9], %13 {strides = array<i32>} : memref<192x256xf32, #tpu.memory_space<vmem>>, vector<8x256xf32>,
    %c90_i32 = arith.constant 90 : i32
    %15 = tpu.dynamic_rotate %1 by %c90_i32 dim 1 : vector<8x256xf32>, i32 -> vector<8x256xf32>
    %c2 = arith.constant 2 : index
    %c0_10 = arith.constant 0 : index
    %c0_11 = arith.constant 0 : index
    %16 = vector.load %arg5[%c2, %c0_10, %c0_11] : memref<24x1x256xf32, #tpu.memory_space<vmem>>, vector<1x1x256xf32>
    %17 = vector.shape_cast %16 : vector<1x1x256xf32> to vector<1x256xf32>
    %18 = vector.broadcast %17 : vector<1x256xf32> to vector<8x256xf32>
    %19 = arith.mulf %15, %18 : vector<8x256xf32>
    %c16 = arith.constant 16 : index
    %c0_12 = arith.constant 0 : index
    %20 = vector.load %arg8[%c16, %c0_12] : memref<192x256xf32, #tpu.memory_space<vmem>>, vector<8x256xf32>
    tpu.vector_store %arg8[%c16, %c0_12], %19 {strides = array<i32>} : memref<192x256xf32, #tpu.memory_space<vmem>>, vector<8x256xf32>,
    %c6_i32 = arith.constant 6 : i32
    %21 = tpu.dynamic_rotate %1 by %c6_i32 dim 1 : vector<8x256xf32>, i32 -> vector<8x256xf32>
    %c3 = arith.constant 3 : index
    %c0_13 = arith.constant 0 : index
    %c0_14 = arith.constant 0 : index
    %22 = vector.load %arg5[%c3, %c0_13, %c0_14] : memref<24x1x256xf32, #tpu.memory_space<vmem>>, vector<1x1x256xf32>
    %23 = vector.shape_cast %22 : vector<1x1x256xf32> to vector<1x256xf32>
    %24 = vector.broadcast %23 : vector<1x256xf32> to vector<8x256xf32>
    %25 = arith.mulf %21, %24 : vector<8x256xf32>
    %c24 = arith.constant 24 : index
    %c0_15 = arith.constant 0 : index
    %26 = vector.load %arg8[%c24, %c0_15] : memref<192x256xf32, #tpu.memory_space<vmem>>, vector<8x256xf32>
    tpu.vector_store %arg8[%c24, %c0_15], %25 {strides = array<i32>} : memref<192x256xf32, #tpu.memory_space<vmem>>, vector<8x256xf32>,
    %c250_i32 = arith.constant 250 : i32
    %27 = tpu.dynamic_rotate %1 by %c250_i32 dim 1 : vector<8x256xf32>, i32 -> vector<8x256xf32>
    %c4 = arith.constant 4 : index
    %c0_16 = arith.constant 0 : index
    %c0_17 = arith.constant 0 : index
    %28 = vector.load %arg5[%c4, %c0_16, %c0_17] : memref<24x1x256xf32, #tpu.memory_space<vmem>>, vector<1x1x256xf32>
    %29 = vector.shape_cast %28 : vector<1x1x256xf32> to vector<1x256xf32>
    %30 = vector.broadcast %29 : vector<1x256xf32> to vector<8x256xf32>
    %31 = arith.mulf %27, %30 : vector<8x256xf32>
    %c32 = arith.constant 32 : index
    %c0_18 = arith.constant 0 : index
    %32 = vector.load %arg8[%c32, %c0_18] : memref<192x256xf32, #tpu.memory_space<vmem>>, vector<8x256xf32>
    tpu.vector_store %arg8[%c32, %c0_18], %31 {strides = array<i32>} : memref<192x256xf32, #tpu.memory_space<vmem>>, vector<8x256xf32>,
    %c166_i32 = arith.constant 166 : i32
    %33 = tpu.dynamic_rotate %1 by %c166_i32 dim 1 : vector<8x256xf32>, i32 -> vector<8x256xf32>
    %c5 = arith.constant 5 : index
    %c0_19 = arith.constant 0 : index
    %c0_20 = arith.constant 0 : index
    %34 = vector.load %arg5[%c5, %c0_19, %c0_20] : memref<24x1x256xf32, #tpu.memory_space<vmem>>, vector<1x1x256xf32>
    %35 = vector.shape_cast %34 : vector<1x1x256xf32> to vector<1x256xf32>
    %36 = vector.broadcast %35 : vector<1x256xf32> to vector<8x256xf32>
    %37 = arith.mulf %33, %36 : vector<8x256xf32>
    %c40 = arith.constant 40 : index
    %c0_21 = arith.constant 0 : index
    %38 = vector.load %arg8[%c40, %c0_21] : memref<192x256xf32, #tpu.memory_space<vmem>>, vector<8x256xf32>
    tpu.vector_store %arg8[%c40, %c0_21], %37 {strides = array<i32>} : memref<192x256xf32, #tpu.memory_space<vmem>>, vector<8x256xf32>,
    %c160_i32 = arith.constant 160 : i32
    %39 = tpu.dynamic_rotate %1 by %c160_i32 dim 1 : vector<8x256xf32>, i32 -> vector<8x256xf32>
    %c6 = arith.constant 6 : index
    %c0_22 = arith.constant 0 : index
    %c0_23 = arith.constant 0 : index
    %40 = vector.load %arg5[%c6, %c0_22, %c0_23] : memref<24x1x256xf32, #tpu.memory_space<vmem>>, vector<1x1x256xf32>
    %41 = vector.shape_cast %40 : vector<1x1x256xf32> to vector<1x256xf32>
    %42 = vector.broadcast %41 : vector<1x256xf32> to vector<8x256xf32>
    %43 = arith.mulf %39, %42 : vector<8x256xf32>
    %c48 = arith.constant 48 : index
    %c0_24 = arith.constant 0 : index
    %44 = vector.load %arg8[%c48, %c0_24] : memref<192x256xf32, #tpu.memory_space<vmem>>, vector<8x256xf32>
    tpu.vector_store %arg8[%c48, %c0_24], %43 {strides = array<i32>} : memref<192x256xf32, #tpu.memory_space<vmem>>, vector<8x256xf32>,
    %c154_i32 = arith.constant 154 : i32
    %45 = tpu.dynamic_rotate %1 by %c154_i32 dim 1 : vector<8x256xf32>, i32 -> vector<8x256xf32>
    %c7 = arith.constant 7 : index
    %c0_25 = arith.constant 0 : index
    %c0_26 = arith.constant 0 : index
    %46 = vector.load %arg5[%c7, %c0_25, %c0_26] : memref<24x1x256xf32, #tpu.memory_space<vmem>>, vector<1x1x256xf32>
    %47 = vector.shape_cast %46 : vector<1x1x256xf32> to vector<1x256xf32>
    %48 = vector.broadcast %47 : vector<1x256xf32> to vector<8x256xf32>
    %49 = arith.mulf %45, %48 : vector<8x256xf32>
    %c56 = arith.constant 56 : index
    %c0_27 = arith.constant 0 : index
    %50 = vector.load %arg8[%c56, %c0_27] : memref<192x256xf32, #tpu.memory_space<vmem>>, vector<8x256xf32>
    tpu.vector_store %arg8[%c56, %c0_27], %49 {strides = array<i32>} : memref<192x256xf32, #tpu.memory_space<vmem>>, vector<8x256xf32>,
    %c204_i32 = arith.constant 204 : i32
    %51 = tpu.dynamic_rotate %1 by %c204_i32 dim 1 : vector<8x256xf32>, i32 -> vector<8x256xf32>
    %c8_28 = arith.constant 8 : index
    %c0_29 = arith.constant 0 : index
    %c0_30 = arith.constant 0 : index
    %52 = vector.load %arg5[%c8_28, %c0_29, %c0_30] : memref<24x1x256xf32, #tpu.memory_space<vmem>>, vector<1x1x256xf32>
    %53 = vector.shape_cast %52 : vector<1x1x256xf32> to vector<1x256xf32>
    %54 = vector.broadcast %53 : vector<1x256xf32> to vector<8x256xf32>
    %55 = arith.mulf %51, %54 : vector<8x256xf32>
    %c64 = arith.constant 64 : index
    %c0_31 = arith.constant 0 : index
    %56 = vector.load %arg8[%c64, %c0_31] : memref<192x256xf32, #tpu.memory_space<vmem>>, vector<8x256xf32>
    tpu.vector_store %arg8[%c64, %c0_31], %55 {strides = array<i32>} : memref<192x256xf32, #tpu.memory_space<vmem>>, vector<8x256xf32>,
    %c192_i32 = arith.constant 192 : i32
    %57 = tpu.dynamic_rotate %1 by %c192_i32 dim 1 : vector<8x256xf32>, i32 -> vector<8x256xf32>
    %c9 = arith.constant 9 : index
    %c0_32 = arith.constant 0 : index
    %c0_33 = arith.constant 0 : index
    %58 = vector.load %arg5[%c9, %c0_32, %c0_33] : memref<24x1x256xf32, #tpu.memory_space<vmem>>, vector<1x1x256xf32>
    %59 = vector.shape_cast %58 : vector<1x1x256xf32> to vector<1x256xf32>
    %60 = vector.broadcast %59 : vector<1x256xf32> to vector<8x256xf32>
    %61 = arith.mulf %57, %60 : vector<8x256xf32>
    %c72 = arith.constant 72 : index
    %c0_34 = arith.constant 0 : index
    %62 = vector.load %arg8[%c72, %c0_34] : memref<192x256xf32, #tpu.memory_space<vmem>>, vector<8x256xf32>
    tpu.vector_store %arg8[%c72, %c0_34], %61 {strides = array<i32>} : memref<192x256xf32, #tpu.memory_space<vmem>>, vector<8x256xf32>,
    %c180_i32 = arith.constant 180 : i32
    %63 = tpu.dynamic_rotate %1 by %c180_i32 dim 1 : vector<8x256xf32>, i32 -> vector<8x256xf32>
    %c10 = arith.constant 10 : index
    %c0_35 = arith.constant 0 : index
    %c0_36 = arith.constant 0 : index
    %64 = vector.load %arg5[%c10, %c0_35, %c0_36] : memref<24x1x256xf32, #tpu.memory_space<vmem>>, vector<1x1x256xf32>
    %65 = vector.shape_cast %64 : vector<1x1x256xf32> to vector<1x256xf32>
    %66 = vector.broadcast %65 : vector<1x256xf32> to vector<8x256xf32>
    %67 = arith.mulf %63, %66 : vector<8x256xf32>
    %c80 = arith.constant 80 : index
    %c0_37 = arith.constant 0 : index
    %68 = vector.load %arg8[%c80, %c0_37] : memref<192x256xf32, #tpu.memory_space<vmem>>, vector<8x256xf32>
    tpu.vector_store %arg8[%c80, %c0_37], %67 {strides = array<i32>} : memref<192x256xf32, #tpu.memory_space<vmem>>, vector<8x256xf32>,
    %c12_i32 = arith.constant 12 : i32
    %69 = tpu.dynamic_rotate %1 by %c12_i32 dim 1 : vector<8x256xf32>, i32 -> vector<8x256xf32>
    %c11 = arith.constant 11 : index
    %c0_38 = arith.constant 0 : index
    %c0_39 = arith.constant 0 : index
    %70 = vector.load %arg5[%c11, %c0_38, %c0_39] : memref<24x1x256xf32, #tpu.memory_space<vmem>>, vector<1x1x256xf32>
    %71 = vector.shape_cast %70 : vector<1x1x256xf32> to vector<1x256xf32>
    %72 = vector.broadcast %71 : vector<1x256xf32> to vector<8x256xf32>
    %73 = arith.mulf %69, %72 : vector<8x256xf32>
    %c88 = arith.constant 88 : index
    %c0_40 = arith.constant 0 : index
    %74 = vector.load %arg8[%c88, %c0_40] : memref<192x256xf32, #tpu.memory_space<vmem>>, vector<8x256xf32>
    tpu.vector_store %arg8[%c88, %c0_40], %73 {strides = array<i32>} : memref<192x256xf32, #tpu.memory_space<vmem>>, vector<8x256xf32>,
    %c244_i32 = arith.constant 244 : i32
    %75 = tpu.dynamic_rotate %1 by %c244_i32 dim 1 : vector<8x256xf32>, i32 -> vector<8x256xf32>
    %c12 = arith.constant 12 : index
    %c0_41 = arith.constant 0 : index
    %c0_42 = arith.constant 0 : index
    %76 = vector.load %arg5[%c12, %c0_41, %c0_42] : memref<24x1x256xf32, #tpu.memory_space<vmem>>, vector<1x1x256xf32>
    %77 = vector.shape_cast %76 : vector<1x1x256xf32> to vector<1x256xf32>
    %78 = vector.broadcast %77 : vector<1x256xf32> to vector<8x256xf32>
    %79 = arith.mulf %75, %78 : vector<8x256xf32>
    %c96 = arith.constant 96 : index
    %c0_43 = arith.constant 0 : index
    %80 = vector.load %arg8[%c96, %c0_43] : memref<192x256xf32, #tpu.memory_space<vmem>>, vector<8x256xf32>
    tpu.vector_store %arg8[%c96, %c0_43], %79 {strides = array<i32>} : memref<192x256xf32, #tpu.memory_space<vmem>>, vector<8x256xf32>,
    %c76_i32 = arith.constant 76 : i32
    %81 = tpu.dynamic_rotate %1 by %c76_i32 dim 1 : vector<8x256xf32>, i32 -> vector<8x256xf32>
    %c13 = arith.constant 13 : index
    %c0_44 = arith.constant 0 : index
    %c0_45 = arith.constant 0 : index
    %82 = vector.load %arg5[%c13, %c0_44, %c0_45] : memref<24x1x256xf32, #tpu.memory_space<vmem>>, vector<1x1x256xf32>
    %83 = vector.shape_cast %82 : vector<1x1x256xf32> to vector<1x256xf32>
    %84 = vector.broadcast %83 : vector<1x256xf32> to vector<8x256xf32>
    %85 = arith.mulf %81, %84 : vector<8x256xf32>
    %c104 = arith.constant 104 : index
    %c0_46 = arith.constant 0 : index
    %86 = vector.load %arg8[%c104, %c0_46] : memref<192x256xf32, #tpu.memory_space<vmem>>, vector<8x256xf32>
    tpu.vector_store %arg8[%c104, %c0_46], %85 {strides = array<i32>} : memref<192x256xf32, #tpu.memory_space<vmem>>, vector<8x256xf32>,
    %c64_i32 = arith.constant 64 : i32
    %87 = tpu.dynamic_rotate %1 by %c64_i32 dim 1 : vector<8x256xf32>, i32 -> vector<8x256xf32>
    %c14 = arith.constant 14 : index
    %c0_47 = arith.constant 0 : index
    %c0_48 = arith.constant 0 : index
    %88 = vector.load %arg5[%c14, %c0_47, %c0_48] : memref<24x1x256xf32, #tpu.memory_space<vmem>>, vector<1x1x256xf32>
    %89 = vector.shape_cast %88 : vector<1x1x256xf32> to vector<1x256xf32>
    %90 = vector.broadcast %89 : vector<1x256xf32> to vector<8x256xf32>
    %91 = arith.mulf %87, %90 : vector<8x256xf32>
    %c112 = arith.constant 112 : index
    %c0_49 = arith.constant 0 : index
    %92 = vector.load %arg8[%c112, %c0_49] : memref<192x256xf32, #tpu.memory_space<vmem>>, vector<8x256xf32>
    tpu.vector_store %arg8[%c112, %c0_49], %91 {strides = array<i32>} : memref<192x256xf32, #tpu.memory_space<vmem>>, vector<8x256xf32>,
    %c52_i32 = arith.constant 52 : i32
    %93 = tpu.dynamic_rotate %1 by %c52_i32 dim 1 : vector<8x256xf32>, i32 -> vector<8x256xf32>
    %c15 = arith.constant 15 : index
    %c0_50 = arith.constant 0 : index
    %c0_51 = arith.constant 0 : index
    %94 = vector.load %arg5[%c15, %c0_50, %c0_51] : memref<24x1x256xf32, #tpu.memory_space<vmem>>, vector<1x1x256xf32>
    %95 = vector.shape_cast %94 : vector<1x1x256xf32> to vector<1x256xf32>
    %96 = vector.broadcast %95 : vector<1x256xf32> to vector<8x256xf32>
    %97 = arith.mulf %93, %96 : vector<8x256xf32>
    %c120 = arith.constant 120 : index
    %c0_52 = arith.constant 0 : index
    %98 = vector.load %arg8[%c120, %c0_52] : memref<192x256xf32, #tpu.memory_space<vmem>>, vector<8x256xf32>
    tpu.vector_store %arg8[%c120, %c0_52], %97 {strides = array<i32>} : memref<192x256xf32, #tpu.memory_space<vmem>>, vector<8x256xf32>,
    %c50_i32 = arith.constant 50 : i32
    %99 = tpu.dynamic_rotate %1 by %c50_i32 dim 1 : vector<8x256xf32>, i32 -> vector<8x256xf32>
    %c16_53 = arith.constant 16 : index
    %c0_54 = arith.constant 0 : index
    %c0_55 = arith.constant 0 : index
    %100 = vector.load %arg5[%c16_53, %c0_54, %c0_55] : memref<24x1x256xf32, #tpu.memory_space<vmem>>, vector<1x1x256xf32>
    %101 = vector.shape_cast %100 : vector<1x1x256xf32> to vector<1x256xf32>
    %102 = vector.broadcast %101 : vector<1x256xf32> to vector<8x256xf32>
    %103 = arith.mulf %99, %102 : vector<8x256xf32>
    %c128 = arith.constant 128 : index
    %c0_56 = arith.constant 0 : index
    %104 = vector.load %arg8[%c128, %c0_56] : memref<192x256xf32, #tpu.memory_space<vmem>>, vector<8x256xf32>
    tpu.vector_store %arg8[%c128, %c0_56], %103 {strides = array<i32>} : memref<192x256xf32, #tpu.memory_space<vmem>>, vector<8x256xf32>,
    %c32_i32 = arith.constant 32 : i32
    %105 = tpu.dynamic_rotate %1 by %c32_i32 dim 1 : vector<8x256xf32>, i32 -> vector<8x256xf32>
    %c17 = arith.constant 17 : index
    %c0_57 = arith.constant 0 : index
    %c0_58 = arith.constant 0 : index
    %106 = vector.load %arg5[%c17, %c0_57, %c0_58] : memref<24x1x256xf32, #tpu.memory_space<vmem>>, vector<1x1x256xf32>
    %107 = vector.shape_cast %106 : vector<1x1x256xf32> to vector<1x256xf32>
    %108 = vector.broadcast %107 : vector<1x256xf32> to vector<8x256xf32>
    %109 = arith.mulf %105, %108 : vector<8x256xf32>
    %c136 = arith.constant 136 : index
    %c0_59 = arith.constant 0 : index
    %110 = vector.load %arg8[%c136, %c0_59] : memref<192x256xf32, #tpu.memory_space<vmem>>, vector<8x256xf32>
    tpu.vector_store %arg8[%c136, %c0_59], %109 {strides = array<i32>} : memref<192x256xf32, #tpu.memory_space<vmem>>, vector<8x256xf32>,
    %c14_i32 = arith.constant 14 : i32
    %111 = tpu.dynamic_rotate %1 by %c14_i32 dim 1 : vector<8x256xf32>, i32 -> vector<8x256xf32>
    %c18 = arith.constant 18 : index
    %c0_60 = arith.constant 0 : index
    %c0_61 = arith.constant 0 : index
    %112 = vector.load %arg5[%c18, %c0_60, %c0_61] : memref<24x1x256xf32, #tpu.memory_space<vmem>>, vector<1x1x256xf32>
    %113 = vector.shape_cast %112 : vector<1x1x256xf32> to vector<1x256xf32>
    %114 = vector.broadcast %113 : vector<1x256xf32> to vector<8x256xf32>
    %115 = arith.mulf %111, %114 : vector<8x256xf32>
    %c144 = arith.constant 144 : index
    %c0_62 = arith.constant 0 : index
    %116 = vector.load %arg8[%c144, %c0_62] : memref<192x256xf32, #tpu.memory_space<vmem>>, vector<8x256xf32>
    tpu.vector_store %arg8[%c144, %c0_62], %115 {strides = array<i32>} : memref<192x256xf32, #tpu.memory_space<vmem>>, vector<8x256xf32>,
    %c18_i32 = arith.constant 18 : i32
    %117 = tpu.dynamic_rotate %1 by %c18_i32 dim 1 : vector<8x256xf32>, i32 -> vector<8x256xf32>
    %c19 = arith.constant 19 : index
    %c0_63 = arith.constant 0 : index
    %c0_64 = arith.constant 0 : index
    %118 = vector.load %arg5[%c19, %c0_63, %c0_64] : memref<24x1x256xf32, #tpu.memory_space<vmem>>, vector<1x1x256xf32>
    %119 = vector.shape_cast %118 : vector<1x1x256xf32> to vector<1x256xf32>
    %120 = vector.broadcast %119 : vector<1x256xf32> to vector<8x256xf32>
    %121 = arith.mulf %117, %120 : vector<8x256xf32>
    %c152 = arith.constant 152 : index
    %c0_65 = arith.constant 0 : index
    %122 = vector.load %arg8[%c152, %c0_65] : memref<192x256xf32, #tpu.memory_space<vmem>>, vector<8x256xf32>
    tpu.vector_store %arg8[%c152, %c0_65], %121 {strides = array<i32>} : memref<192x256xf32, #tpu.memory_space<vmem>>, vector<8x256xf32>,
    %c238_i32 = arith.constant 238 : i32
    %123 = tpu.dynamic_rotate %1 by %c238_i32 dim 1 : vector<8x256xf32>, i32 -> vector<8x256xf32>
    %c20 = arith.constant 20 : index
    %c0_66 = arith.constant 0 : index
    %c0_67 = arith.constant 0 : index
    %124 = vector.load %arg5[%c20, %c0_66, %c0_67] : memref<24x1x256xf32, #tpu.memory_space<vmem>>, vector<1x1x256xf32>
    %125 = vector.shape_cast %124 : vector<1x1x256xf32> to vector<1x256xf32>
    %126 = vector.broadcast %125 : vector<1x256xf32> to vector<8x256xf32>
    %127 = arith.mulf %123, %126 : vector<8x256xf32>
    %c160 = arith.constant 160 : index
    %c0_68 = arith.constant 0 : index
    %128 = vector.load %arg8[%c160, %c0_68] : memref<192x256xf32, #tpu.memory_space<vmem>>, vector<8x256xf32>
    tpu.vector_store %arg8[%c160, %c0_68], %127 {strides = array<i32>} : memref<192x256xf32, #tpu.memory_space<vmem>>, vector<8x256xf32>,
    %c242_i32 = arith.constant 242 : i32
    %129 = tpu.dynamic_rotate %1 by %c242_i32 dim 1 : vector<8x256xf32>, i32 -> vector<8x256xf32>
    %c21 = arith.constant 21 : index
    %c0_69 = arith.constant 0 : index
    %c0_70 = arith.constant 0 : index
    %130 = vector.load %arg5[%c21, %c0_69, %c0_70] : memref<24x1x256xf32, #tpu.memory_space<vmem>>, vector<1x1x256xf32>
    %131 = vector.shape_cast %130 : vector<1x1x256xf32> to vector<1x256xf32>
    %132 = vector.broadcast %131 : vector<1x256xf32> to vector<8x256xf32>
    %133 = arith.mulf %129, %132 : vector<8x256xf32>
    %c168 = arith.constant 168 : index
    %c0_71 = arith.constant 0 : index
    %134 = vector.load %arg8[%c168, %c0_71] : memref<192x256xf32, #tpu.memory_space<vmem>>, vector<8x256xf32>
    tpu.vector_store %arg8[%c168, %c0_71], %133 {strides = array<i32>} : memref<192x256xf32, #tpu.memory_space<vmem>>, vector<8x256xf32>,
    %c224_i32 = arith.constant 224 : i32
    %135 = tpu.dynamic_rotate %1 by %c224_i32 dim 1 : vector<8x256xf32>, i32 -> vector<8x256xf32>
    %c22 = arith.constant 22 : index
    %c0_72 = arith.constant 0 : index
    %c0_73 = arith.constant 0 : index
    %136 = vector.load %arg5[%c22, %c0_72, %c0_73] : memref<24x1x256xf32, #tpu.memory_space<vmem>>, vector<1x1x256xf32>
    %137 = vector.shape_cast %136 : vector<1x1x256xf32> to vector<1x256xf32>
    %138 = vector.broadcast %137 : vector<1x256xf32> to vector<8x256xf32>
    %139 = arith.mulf %135, %138 : vector<8x256xf32>
    %c176 = arith.constant 176 : index
    %c0_74 = arith.constant 0 : index
    %140 = vector.load %arg8[%c176, %c0_74] : memref<192x256xf32, #tpu.memory_space<vmem>>, vector<8x256xf32>
    tpu.vector_store %arg8[%c176, %c0_74], %139 {strides = array<i32>} : memref<192x256xf32, #tpu.memory_space<vmem>>, vector<8x256xf32>,
    %c206_i32 = arith.constant 206 : i32
    %141 = tpu.dynamic_rotate %1 by %c206_i32 dim 1 : vector<8x256xf32>, i32 -> vector<8x256xf32>
    %c23 = arith.constant 23 : index
    %c0_75 = arith.constant 0 : index
    %c0_76 = arith.constant 0 : index
    %142 = vector.load %arg5[%c23, %c0_75, %c0_76] : memref<24x1x256xf32, #tpu.memory_space<vmem>>, vector<1x1x256xf32>
    %143 = vector.shape_cast %142 : vector<1x1x256xf32> to vector<1x256xf32>
    %144 = vector.broadcast %143 : vector<1x256xf32> to vector<8x256xf32>
    %145 = arith.mulf %141, %144 : vector<8x256xf32>
    %c184 = arith.constant 184 : index
    %c0_77 = arith.constant 0 : index
    %146 = vector.load %arg8[%c184, %c0_77] : memref<192x256xf32, #tpu.memory_space<vmem>>, vector<8x256xf32>
    tpu.vector_store %arg8[%c184, %c0_77], %145 {strides = array<i32>} : memref<192x256xf32, #tpu.memory_space<vmem>>, vector<8x256xf32>,
    %c0_78 = arith.constant 0 : index
    %c0_79 = arith.constant 0 : index
    %147 = vector.load %arg2[%c0_78, %c0_79] : memref<8x8xbf16, #tpu.memory_space<vmem>>, vector<8x8xbf16>
    %cst = arith.constant dense<0.000000e+00> : vector<8x256xf32>
    %148 = tpu.matmul %147, %2, %cst {dimension_numbers = #tpu.dot_dimension_numbers<[1], [0], [0], [1], [0, 0, 1, 1], [], []>} : vector<8x8xbf16>, vector<8x256xbf16>, vector<8x256xf32> -> vector<8x256xf32>
    %c0_80 = arith.constant 0 : index
    %c0_81 = arith.constant 0 : index
    %149 = vector.load %arg3[%c0_80, %c0_81] : memref<8x192xbf16, #tpu.memory_space<vmem>>, vector<8x192xbf16>
    %c0_82 = arith.constant 0 : index
    %c0_83 = arith.constant 0 : index
    %150 = vector.load %arg8[%c0_82, %c0_83] : memref<192x256xf32, #tpu.memory_space<vmem>>, vector<192x256xf32>
    %151 = arith.truncf %150 : vector<192x256xf32> to vector<192x256xbf16>
    %cst_84 = arith.constant dense<0.000000e+00> : vector<8x256xf32>
    %152 = tpu.matmul %149, %151, %cst_84 {dimension_numbers = #tpu.dot_dimension_numbers<[1], [0], [0], [1], [0, 0, 1, 1], [], []>} : vector<8x192xbf16>, vector<192x256xbf16>, vector<8x256xf32> -> vector<8x256xf32>
    %153 = arith.addf %148, %152 : vector<8x256xf32>
    %cst_85 = arith.constant dense<0.000000e+00> : vector<8xf32>
    %154 = vector.multi_reduction <add>, %1, %cst_85 [1] : vector<8x256xf32> to vector<8xf32>
    %155 = vector.shape_cast %154 : vector<8xf32> to vector<8x1xf32>
    %cst_86 = arith.constant 3.906250e-03 : f32
    %156 = vector.broadcast %cst_86 : f32 to vector<8x1xf32>
    %157 = arith.mulf %155, %156 : vector<8x1xf32>
    %c0_87 = arith.constant 0 : index
    %c0_88 = arith.constant 0 : index
    %158 = vector.load %arg4[%c0_87, %c0_88] : memref<8x8xf32, #tpu.memory_space<vmem>>, vector<8x8xf32>
    %cst_89 = arith.constant dense<0.000000e+00> : vector<8x1xf32>
    %159 = tpu.matmul %158, %157, %cst_89 {dimension_numbers = #tpu.dot_dimension_numbers<[1], [0], [0], [1], [0, 0, 1, 1], [], []>} : vector<8x8xf32>, vector<8x1xf32>, vector<8x1xf32> -> vector<8x1xf32>
    %c0_90 = arith.constant 0 : index
    %c0_91 = arith.constant 0 : index
    %160 = vector.load %arg6[%c0_90, %c0_91] : memref<8x1xf32, #tpu.memory_space<vmem>>, vector<8x1xf32>
    %161 = arith.addf %159, %160 : vector<8x1xf32>
    %162 = vector.broadcast %161 : vector<8x1xf32> to vector<8x256xf32>
    %163 = arith.addf %153, %162 : vector<8x256xf32>
    %c0_92 = arith.constant 0 : index
    %c0_93 = arith.constant 0 : index
    %c0_94 = arith.constant 0 : index
    %164 = vector.load %arg7[%c0_92, %c0_93, %c0_94] : memref<1x8x256xf32, #tpu.memory_space<vmem>>, vector<1x8x256xf32>
    %165 = vector.shape_cast %164 : vector<1x8x256xf32> to vector<8x256xf32>
    %166 = vector.shape_cast %163 : vector<8x256xf32> to vector<1x8x256xf32>
    tpu.vector_store %arg7[%c0_92, %c0_93, %c0_94], %166 {strides = array<i32>} : memref<1x8x256xf32, #tpu.memory_space<vmem>>, vector<1x8x256xf32>,
    return
  }
  func.func @transform_0(%arg0: i32) -> (i32, i32, i32) {
    %c0_i32 = arith.constant 0 : i32
    %c0_i32_0 = arith.constant 0 : i32
    %c0_i32_1 = arith.constant 0 : i32
    return %arg0, %c0_i32, %c0_i32_0 : i32, i32, i32
  }
  func.func @transform_1(%arg0: i32) -> (i32, i32) {
    %c0_i32 = arith.constant 0 : i32
    %c0_i32_0 = arith.constant 0 : i32
    %c0_i32_1 = arith.constant 0 : i32
    return %c0_i32, %c0_i32_0 : i32, i32
  }
  func.func @transform_2(%arg0: i32) -> (i32, i32) {
    %c0_i32 = arith.constant 0 : i32
    %c0_i32_0 = arith.constant 0 : i32
    %c0_i32_1 = arith.constant 0 : i32
    return %c0_i32, %c0_i32_0 : i32, i32
  }
  func.func @transform_3(%arg0: i32) -> (i32, i32) {
    %c0_i32 = arith.constant 0 : i32
    %c0_i32_0 = arith.constant 0 : i32
    %c0_i32_1 = arith.constant 0 : i32
    return %c0_i32, %c0_i32_0 : i32, i32
  }
  func.func @transform_4(%arg0: i32) -> (i32, i32, i32) {
    %c0_i32 = arith.constant 0 : i32
    %c0_i32_0 = arith.constant 0 : i32
    %c0_i32_1 = arith.constant 0 : i32
    %c0_i32_2 = arith.constant 0 : i32
    return %c0_i32, %c0_i32_0, %c0_i32_1 : i32, i32, i32
  }
  func.func @transform_5(%arg0: i32) -> (i32, i32) {
    %c0_i32 = arith.constant 0 : i32
    %c0_i32_0 = arith.constant 0 : i32
    %c0_i32_1 = arith.constant 0 : i32
    return %c0_i32, %c0_i32_0 : i32, i32
  }
  func.func @transform_6(%arg0: i32) -> (i32, i32, i32) {
    %c0_i32 = arith.constant 0 : i32
    %c0_i32_0 = arith.constant 0 : i32
    %c0_i32_1 = arith.constant 0 : i32
    return %arg0, %c0_i32, %c0_i32_0 : i32, i32, i32
  }
}

module attributes {stable_mosaic.version = 11 : i64} {
  func.func @_aspp_stack_kernel(%arg0: i32, %arg1: memref<1x8x256xf32, #tpu.memory_space<vmem>>, %arg2: memref<8x8xbf16, #tpu.memory_space<vmem>>, %arg3: memref<8x192xbf16, #tpu.memory_space<vmem>>, %arg4: memref<8x8xf32, #tpu.memory_space<vmem>>, %arg5: memref<24x1x256xf32, #tpu.memory_space<vmem>>, %arg6: memref<8x1xf32, #tpu.memory_space<vmem>>, %arg7: memref<1x8x256xf32, #tpu.memory_space<vmem>>, %arg8: memref<192x256xf32, #tpu.memory_space<vmem>>) attributes {dimension_semantics = [#tpu.dimension_semantics<parallel>], iteration_bounds = array<i64: 2>, scalar_prefetch = 0 : i64, scratch_operands = 1 : i64, tpu.core_type = #tpu.core_type<tc>, window_params = [{transform_indices = @transform_0, window_bounds = array<i64: 1, 8, 256>}, {pipeline_mode = #tpu.pipeline_mode<synchronous>, transform_indices = @transform_1, window_bounds = array<i64: 8, 8>}, {pipeline_mode = #tpu.pipeline_mode<synchronous>, transform_indices = @transform_2, window_bounds = array<i64: 8, 192>}, {pipeline_mode = #tpu.pipeline_mode<synchronous>, transform_indices = @transform_3, window_bounds = array<i64: 8, 8>}, {pipeline_mode = #tpu.pipeline_mode<synchronous>, transform_indices = @transform_4, window_bounds = array<i64: 24, 1, 256>}, {pipeline_mode = #tpu.pipeline_mode<synchronous>, transform_indices = @transform_5, window_bounds = array<i64: 8, 1>}, {transform_indices = @transform_6, window_bounds = array<i64: 1, 8, 256>}]} {
    %c0 = arith.constant 0 : index
    %c0_0 = arith.constant 0 : index
    %c0_1 = arith.constant 0 : index
    %0 = vector.load %arg1[%c0, %c0_0, %c0_1] : memref<1x8x256xf32, #tpu.memory_space<vmem>>, vector<1x8x256xf32>
    %1 = vector.shape_cast %0 : vector<1x8x256xf32> to vector<8x256xf32>
    %2 = arith.truncf %1 : vector<8x256xf32> to vector<8x256xbf16>
    %c102_i32 = arith.constant 102 : i32
    %3 = tpu.dynamic_rotate %1 by %c102_i32 dim 1 : vector<8x256xf32>, i32 -> vector<8x256xf32>
    %c0_2 = arith.constant 0 : index
    %c0_3 = arith.constant 0 : index
    %c0_4 = arith.constant 0 : index
    %4 = vector.load %arg5[%c0_2, %c0_3, %c0_4] : memref<24x1x256xf32, #tpu.memory_space<vmem>>, vector<1x1x256xf32>
    %5 = vector.shape_cast %4 : vector<1x1x256xf32> to vector<1x256xf32>
    %6 = vector.broadcast %5 : vector<1x256xf32> to vector<8x256xf32>
    %7 = arith.mulf %3, %6 : vector<8x256xf32>
    %c0_5 = arith.constant 0 : index
    %c0_6 = arith.constant 0 : index
    %8 = vector.load %arg8[%c0_5, %c0_6] : memref<192x256xf32, #tpu.memory_space<vmem>>, vector<8x256xf32>
    tpu.vector_store %arg8[%c0_5, %c0_6], %7 {strides = array<i32>} : memref<192x256xf32, #tpu.memory_space<vmem>>, vector<8x256xf32>,
    %c96_i32 = arith.constant 96 : i32
    %9 = tpu.dynamic_rotate %1 by %c96_i32 dim 1 : vector<8x256xf32>, i32 -> vector<8x256xf32>
    %c1 = arith.constant 1 : index
    %c0_7 = arith.constant 0 : index
    %c0_8 = arith.constant 0 : index
    %10 = vector.load %arg5[%c1, %c0_7, %c0_8] : memref<24x1x256xf32, #tpu.memory_space<vmem>>, vector<1x1x256xf32>
    %11 = vector.shape_cast %10 : vector<1x1x256xf32> to vector<1x256xf32>
    %12 = vector.broadcast %11 : vector<1x256xf32> to vector<8x256xf32>
    %13 = arith.mulf %9, %12 : vector<8x256xf32>
    %c8 = arith.constant 8 : index
    %c0_9 = arith.constant 0 : index
    %14 = vector.load %arg8[%c8, %c0_9] : memref<192x256xf32, #tpu.memory_space<vmem>>, vector<8x256xf32>
    tpu.vector_store %arg8[%c8, %c0_9], %13 {strides = array<i32>} : memref<192x256xf32, #tpu.memory_space<vmem>>, vector<8x256xf32>,
    %c90_i32 = arith.constant 90 : i32
    %15 = tpu.dynamic_rotate %1 by %c90_i32 dim 1 : vector<8x256xf32>, i32 -> vector<8x256xf32>
    %c2 = arith.constant 2 : index
    %c0_10 = arith.constant 0 : index
    %c0_11 = arith.constant 0 : index
    %16 = vector.load %arg5[%c2, %c0_10, %c0_11] : memref<24x1x256xf32, #tpu.memory_space<vmem>>, vector<1x1x256xf32>
    %17 = vector.shape_cast %16 : vector<1x1x256xf32> to vector<1x256xf32>
    %18 = vector.broadcast %17 : vector<1x256xf32> to vector<8x256xf32>
    %19 = arith.mulf %15, %18 : vector<8x256xf32>
    %c16 = arith.constant 16 : index
    %c0_12 = arith.constant 0 : index
    %20 = vector.load %arg8[%c16, %c0_12] : memref<192x256xf32, #tpu.memory_space<vmem>>, vector<8x256xf32>
    tpu.vector_store %arg8[%c16, %c0_12], %19 {strides = array<i32>} : memref<192x256xf32, #tpu.memory_space<vmem>>, vector<8x256xf32>,
    %c6_i32 = arith.constant 6 : i32
    %21 = tpu.dynamic_rotate %1 by %c6_i32 dim 1 : vector<8x256xf32>, i32 -> vector<8x256xf32>
    %c3 = arith.constant 3 : index
    %c0_13 = arith.constant 0 : index
    %c0_14 = arith.constant 0 : index
    %22 = vector.load %arg5[%c3, %c0_13, %c0_14] : memref<24x1x256xf32, #tpu.memory_space<vmem>>, vector<1x1x256xf32>
    %23 = vector.shape_cast %22 : vector<1x1x256xf32> to vector<1x256xf32>
    %24 = vector.broadcast %23 : vector<1x256xf32> to vector<8x256xf32>
    %25 = arith.mulf %21, %24 : vector<8x256xf32>
    %c24 = arith.constant 24 : index
    %c0_15 = arith.constant 0 : index
    %26 = vector.load %arg8[%c24, %c0_15] : memref<192x256xf32, #tpu.memory_space<vmem>>, vector<8x256xf32>
    tpu.vector_store %arg8[%c24, %c0_15], %25 {strides = array<i32>} : memref<192x256xf32, #tpu.memory_space<vmem>>, vector<8x256xf32>,
    %c250_i32 = arith.constant 250 : i32
    %27 = tpu.dynamic_rotate %1 by %c250_i32 dim 1 : vector<8x256xf32>, i32 -> vector<8x256xf32>
    %c4 = arith.constant 4 : index
    %c0_16 = arith.constant 0 : index
    %c0_17 = arith.constant 0 : index
    %28 = vector.load %arg5[%c4, %c0_16, %c0_17] : memref<24x1x256xf32, #tpu.memory_space<vmem>>, vector<1x1x256xf32>
    %29 = vector.shape_cast %28 : vector<1x1x256xf32> to vector<1x256xf32>
    %30 = vector.broadcast %29 : vector<1x256xf32> to vector<8x256xf32>
    %31 = arith.mulf %27, %30 : vector<8x256xf32>
    %c32 = arith.constant 32 : index
    %c0_18 = arith.constant 0 : index
    %32 = vector.load %arg8[%c32, %c0_18] : memref<192x256xf32, #tpu.memory_space<vmem>>, vector<8x256xf32>
    tpu.vector_store %arg8[%c32, %c0_18], %31 {strides = array<i32>} : memref<192x256xf32, #tpu.memory_space<vmem>>, vector<8x256xf32>,
    %c166_i32 = arith.constant 166 : i32
    %33 = tpu.dynamic_rotate %1 by %c166_i32 dim 1 : vector<8x256xf32>, i32 -> vector<8x256xf32>
    %c5 = arith.constant 5 : index
    %c0_19 = arith.constant 0 : index
    %c0_20 = arith.constant 0 : index
    %34 = vector.load %arg5[%c5, %c0_19, %c0_20] : memref<24x1x256xf32, #tpu.memory_space<vmem>>, vector<1x1x256xf32>
    %35 = vector.shape_cast %34 : vector<1x1x256xf32> to vector<1x256xf32>
    %36 = vector.broadcast %35 : vector<1x256xf32> to vector<8x256xf32>
    %37 = arith.mulf %33, %36 : vector<8x256xf32>
    %c40 = arith.constant 40 : index
    %c0_21 = arith.constant 0 : index
    %38 = vector.load %arg8[%c40, %c0_21] : memref<192x256xf32, #tpu.memory_space<vmem>>, vector<8x256xf32>
    tpu.vector_store %arg8[%c40, %c0_21], %37 {strides = array<i32>} : memref<192x256xf32, #tpu.memory_space<vmem>>, vector<8x256xf32>,
    %c160_i32 = arith.constant 160 : i32
    %39 = tpu.dynamic_rotate %1 by %c160_i32 dim 1 : vector<8x256xf32>, i32 -> vector<8x256xf32>
    %c6 = arith.constant 6 : index
    %c0_22 = arith.constant 0 : index
    %c0_23 = arith.constant 0 : index
    %40 = vector.load %arg5[%c6, %c0_22, %c0_23] : memref<24x1x256xf32, #tpu.memory_space<vmem>>, vector<1x1x256xf32>
    %41 = vector.shape_cast %40 : vector<1x1x256xf32> to vector<1x256xf32>
    %42 = vector.broadcast %41 : vector<1x256xf32> to vector<8x256xf32>
    %43 = arith.mulf %39, %42 : vector<8x256xf32>
    %c48 = arith.constant 48 : index
    %c0_24 = arith.constant 0 : index
    %44 = vector.load %arg8[%c48, %c0_24] : memref<192x256xf32, #tpu.memory_space<vmem>>, vector<8x256xf32>
    tpu.vector_store %arg8[%c48, %c0_24], %43 {strides = array<i32>} : memref<192x256xf32, #tpu.memory_space<vmem>>, vector<8x256xf32>,
    %c154_i32 = arith.constant 154 : i32
    %45 = tpu.dynamic_rotate %1 by %c154_i32 dim 1 : vector<8x256xf32>, i32 -> vector<8x256xf32>
    %c7 = arith.constant 7 : index
    %c0_25 = arith.constant 0 : index
    %c0_26 = arith.constant 0 : index
    %46 = vector.load %arg5[%c7, %c0_25, %c0_26] : memref<24x1x256xf32, #tpu.memory_space<vmem>>, vector<1x1x256xf32>
    %47 = vector.shape_cast %46 : vector<1x1x256xf32> to vector<1x256xf32>
    %48 = vector.broadcast %47 : vector<1x256xf32> to vector<8x256xf32>
    %49 = arith.mulf %45, %48 : vector<8x256xf32>
    %c56 = arith.constant 56 : index
    %c0_27 = arith.constant 0 : index
    %50 = vector.load %arg8[%c56, %c0_27] : memref<192x256xf32, #tpu.memory_space<vmem>>, vector<8x256xf32>
    tpu.vector_store %arg8[%c56, %c0_27], %49 {strides = array<i32>} : memref<192x256xf32, #tpu.memory_space<vmem>>, vector<8x256xf32>,
    %c204_i32 = arith.constant 204 : i32
    %51 = tpu.dynamic_rotate %1 by %c204_i32 dim 1 : vector<8x256xf32>, i32 -> vector<8x256xf32>
    %c8_28 = arith.constant 8 : index
    %c0_29 = arith.constant 0 : index
    %c0_30 = arith.constant 0 : index
    %52 = vector.load %arg5[%c8_28, %c0_29, %c0_30] : memref<24x1x256xf32, #tpu.memory_space<vmem>>, vector<1x1x256xf32>
    %53 = vector.shape_cast %52 : vector<1x1x256xf32> to vector<1x256xf32>
    %54 = vector.broadcast %53 : vector<1x256xf32> to vector<8x256xf32>
    %55 = arith.mulf %51, %54 : vector<8x256xf32>
    %c64 = arith.constant 64 : index
    %c0_31 = arith.constant 0 : index
    %56 = vector.load %arg8[%c64, %c0_31] : memref<192x256xf32, #tpu.memory_space<vmem>>, vector<8x256xf32>
    tpu.vector_store %arg8[%c64, %c0_31], %55 {strides = array<i32>} : memref<192x256xf32, #tpu.memory_space<vmem>>, vector<8x256xf32>,
    %c192_i32 = arith.constant 192 : i32
    %57 = tpu.dynamic_rotate %1 by %c192_i32 dim 1 : vector<8x256xf32>, i32 -> vector<8x256xf32>
    %c9 = arith.constant 9 : index
    %c0_32 = arith.constant 0 : index
    %c0_33 = arith.constant 0 : index
    %58 = vector.load %arg5[%c9, %c0_32, %c0_33] : memref<24x1x256xf32, #tpu.memory_space<vmem>>, vector<1x1x256xf32>
    %59 = vector.shape_cast %58 : vector<1x1x256xf32> to vector<1x256xf32>
    %60 = vector.broadcast %59 : vector<1x256xf32> to vector<8x256xf32>
    %61 = arith.mulf %57, %60 : vector<8x256xf32>
    %c72 = arith.constant 72 : index
    %c0_34 = arith.constant 0 : index
    %62 = vector.load %arg8[%c72, %c0_34] : memref<192x256xf32, #tpu.memory_space<vmem>>, vector<8x256xf32>
    tpu.vector_store %arg8[%c72, %c0_34], %61 {strides = array<i32>} : memref<192x256xf32, #tpu.memory_space<vmem>>, vector<8x256xf32>,
    %c180_i32 = arith.constant 180 : i32
    %63 = tpu.dynamic_rotate %1 by %c180_i32 dim 1 : vector<8x256xf32>, i32 -> vector<8x256xf32>
    %c10 = arith.constant 10 : index
    %c0_35 = arith.constant 0 : index
    %c0_36 = arith.constant 0 : index
    %64 = vector.load %arg5[%c10, %c0_35, %c0_36] : memref<24x1x256xf32, #tpu.memory_space<vmem>>, vector<1x1x256xf32>
    %65 = vector.shape_cast %64 : vector<1x1x256xf32> to vector<1x256xf32>
    %66 = vector.broadcast %65 : vector<1x256xf32> to vector<8x256xf32>
    %67 = arith.mulf %63, %66 : vector<8x256xf32>
    %c80 = arith.constant 80 : index
    %c0_37 = arith.constant 0 : index
    %68 = vector.load %arg8[%c80, %c0_37] : memref<192x256xf32, #tpu.memory_space<vmem>>, vector<8x256xf32>
    tpu.vector_store %arg8[%c80, %c0_37], %67 {strides = array<i32>} : memref<192x256xf32, #tpu.memory_space<vmem>>, vector<8x256xf32>,
    %c12_i32 = arith.constant 12 : i32
    %69 = tpu.dynamic_rotate %1 by %c12_i32 dim 1 : vector<8x256xf32>, i32 -> vector<8x256xf32>
    %c11 = arith.constant 11 : index
    %c0_38 = arith.constant 0 : index
    %c0_39 = arith.constant 0 : index
    %70 = vector.load %arg5[%c11, %c0_38, %c0_39] : memref<24x1x256xf32, #tpu.memory_space<vmem>>, vector<1x1x256xf32>
    %71 = vector.shape_cast %70 : vector<1x1x256xf32> to vector<1x256xf32>
    %72 = vector.broadcast %71 : vector<1x256xf32> to vector<8x256xf32>
    %73 = arith.mulf %69, %72 : vector<8x256xf32>
    %c88 = arith.constant 88 : index
    %c0_40 = arith.constant 0 : index
    %74 = vector.load %arg8[%c88, %c0_40] : memref<192x256xf32, #tpu.memory_space<vmem>>, vector<8x256xf32>
    tpu.vector_store %arg8[%c88, %c0_40], %73 {strides = array<i32>} : memref<192x256xf32, #tpu.memory_space<vmem>>, vector<8x256xf32>,
    %c244_i32 = arith.constant 244 : i32
    %75 = tpu.dynamic_rotate %1 by %c244_i32 dim 1 : vector<8x256xf32>, i32 -> vector<8x256xf32>
    %c12 = arith.constant 12 : index
    %c0_41 = arith.constant 0 : index
    %c0_42 = arith.constant 0 : index
    %76 = vector.load %arg5[%c12, %c0_41, %c0_42] : memref<24x1x256xf32, #tpu.memory_space<vmem>>, vector<1x1x256xf32>
    %77 = vector.shape_cast %76 : vector<1x1x256xf32> to vector<1x256xf32>
    %78 = vector.broadcast %77 : vector<1x256xf32> to vector<8x256xf32>
    %79 = arith.mulf %75, %78 : vector<8x256xf32>
    %c96 = arith.constant 96 : index
    %c0_43 = arith.constant 0 : index
    %80 = vector.load %arg8[%c96, %c0_43] : memref<192x256xf32, #tpu.memory_space<vmem>>, vector<8x256xf32>
    tpu.vector_store %arg8[%c96, %c0_43], %79 {strides = array<i32>} : memref<192x256xf32, #tpu.memory_space<vmem>>, vector<8x256xf32>,
    %c76_i32 = arith.constant 76 : i32
    %81 = tpu.dynamic_rotate %1 by %c76_i32 dim 1 : vector<8x256xf32>, i32 -> vector<8x256xf32>
    %c13 = arith.constant 13 : index
    %c0_44 = arith.constant 0 : index
    %c0_45 = arith.constant 0 : index
    %82 = vector.load %arg5[%c13, %c0_44, %c0_45] : memref<24x1x256xf32, #tpu.memory_space<vmem>>, vector<1x1x256xf32>
    %83 = vector.shape_cast %82 : vector<1x1x256xf32> to vector<1x256xf32>
    %84 = vector.broadcast %83 : vector<1x256xf32> to vector<8x256xf32>
    %85 = arith.mulf %81, %84 : vector<8x256xf32>
    %c104 = arith.constant 104 : index
    %c0_46 = arith.constant 0 : index
    %86 = vector.load %arg8[%c104, %c0_46] : memref<192x256xf32, #tpu.memory_space<vmem>>, vector<8x256xf32>
    tpu.vector_store %arg8[%c104, %c0_46], %85 {strides = array<i32>} : memref<192x256xf32, #tpu.memory_space<vmem>>, vector<8x256xf32>,
    %c64_i32 = arith.constant 64 : i32
    %87 = tpu.dynamic_rotate %1 by %c64_i32 dim 1 : vector<8x256xf32>, i32 -> vector<8x256xf32>
    %c14 = arith.constant 14 : index
    %c0_47 = arith.constant 0 : index
    %c0_48 = arith.constant 0 : index
    %88 = vector.load %arg5[%c14, %c0_47, %c0_48] : memref<24x1x256xf32, #tpu.memory_space<vmem>>, vector<1x1x256xf32>
    %89 = vector.shape_cast %88 : vector<1x1x256xf32> to vector<1x256xf32>
    %90 = vector.broadcast %89 : vector<1x256xf32> to vector<8x256xf32>
    %91 = arith.mulf %87, %90 : vector<8x256xf32>
    %c112 = arith.constant 112 : index
    %c0_49 = arith.constant 0 : index
    %92 = vector.load %arg8[%c112, %c0_49] : memref<192x256xf32, #tpu.memory_space<vmem>>, vector<8x256xf32>
    tpu.vector_store %arg8[%c112, %c0_49], %91 {strides = array<i32>} : memref<192x256xf32, #tpu.memory_space<vmem>>, vector<8x256xf32>,
    %c52_i32 = arith.constant 52 : i32
    %93 = tpu.dynamic_rotate %1 by %c52_i32 dim 1 : vector<8x256xf32>, i32 -> vector<8x256xf32>
    %c15 = arith.constant 15 : index
    %c0_50 = arith.constant 0 : index
    %c0_51 = arith.constant 0 : index
    %94 = vector.load %arg5[%c15, %c0_50, %c0_51] : memref<24x1x256xf32, #tpu.memory_space<vmem>>, vector<1x1x256xf32>
    %95 = vector.shape_cast %94 : vector<1x1x256xf32> to vector<1x256xf32>
    %96 = vector.broadcast %95 : vector<1x256xf32> to vector<8x256xf32>
    %97 = arith.mulf %93, %96 : vector<8x256xf32>
    %c120 = arith.constant 120 : index
    %c0_52 = arith.constant 0 : index
    %98 = vector.load %arg8[%c120, %c0_52] : memref<192x256xf32, #tpu.memory_space<vmem>>, vector<8x256xf32>
    tpu.vector_store %arg8[%c120, %c0_52], %97 {strides = array<i32>} : memref<192x256xf32, #tpu.memory_space<vmem>>, vector<8x256xf32>,
    %c50_i32 = arith.constant 50 : i32
    %99 = tpu.dynamic_rotate %1 by %c50_i32 dim 1 : vector<8x256xf32>, i32 -> vector<8x256xf32>
    %c16_53 = arith.constant 16 : index
    %c0_54 = arith.constant 0 : index
    %c0_55 = arith.constant 0 : index
    %100 = vector.load %arg5[%c16_53, %c0_54, %c0_55] : memref<24x1x256xf32, #tpu.memory_space<vmem>>, vector<1x1x256xf32>
    %101 = vector.shape_cast %100 : vector<1x1x256xf32> to vector<1x256xf32>
    %102 = vector.broadcast %101 : vector<1x256xf32> to vector<8x256xf32>
    %103 = arith.mulf %99, %102 : vector<8x256xf32>
    %c128 = arith.constant 128 : index
    %c0_56 = arith.constant 0 : index
    %104 = vector.load %arg8[%c128, %c0_56] : memref<192x256xf32, #tpu.memory_space<vmem>>, vector<8x256xf32>
    tpu.vector_store %arg8[%c128, %c0_56], %103 {strides = array<i32>} : memref<192x256xf32, #tpu.memory_space<vmem>>, vector<8x256xf32>,
    %c32_i32 = arith.constant 32 : i32
    %105 = tpu.dynamic_rotate %1 by %c32_i32 dim 1 : vector<8x256xf32>, i32 -> vector<8x256xf32>
    %c17 = arith.constant 17 : index
    %c0_57 = arith.constant 0 : index
    %c0_58 = arith.constant 0 : index
    %106 = vector.load %arg5[%c17, %c0_57, %c0_58] : memref<24x1x256xf32, #tpu.memory_space<vmem>>, vector<1x1x256xf32>
    %107 = vector.shape_cast %106 : vector<1x1x256xf32> to vector<1x256xf32>
    %108 = vector.broadcast %107 : vector<1x256xf32> to vector<8x256xf32>
    %109 = arith.mulf %105, %108 : vector<8x256xf32>
    %c136 = arith.constant 136 : index
    %c0_59 = arith.constant 0 : index
    %110 = vector.load %arg8[%c136, %c0_59] : memref<192x256xf32, #tpu.memory_space<vmem>>, vector<8x256xf32>
    tpu.vector_store %arg8[%c136, %c0_59], %109 {strides = array<i32>} : memref<192x256xf32, #tpu.memory_space<vmem>>, vector<8x256xf32>,
    %c14_i32 = arith.constant 14 : i32
    %111 = tpu.dynamic_rotate %1 by %c14_i32 dim 1 : vector<8x256xf32>, i32 -> vector<8x256xf32>
    %c18 = arith.constant 18 : index
    %c0_60 = arith.constant 0 : index
    %c0_61 = arith.constant 0 : index
    %112 = vector.load %arg5[%c18, %c0_60, %c0_61] : memref<24x1x256xf32, #tpu.memory_space<vmem>>, vector<1x1x256xf32>
    %113 = vector.shape_cast %112 : vector<1x1x256xf32> to vector<1x256xf32>
    %114 = vector.broadcast %113 : vector<1x256xf32> to vector<8x256xf32>
    %115 = arith.mulf %111, %114 : vector<8x256xf32>
    %c144 = arith.constant 144 : index
    %c0_62 = arith.constant 0 : index
    %116 = vector.load %arg8[%c144, %c0_62] : memref<192x256xf32, #tpu.memory_space<vmem>>, vector<8x256xf32>
    tpu.vector_store %arg8[%c144, %c0_62], %115 {strides = array<i32>} : memref<192x256xf32, #tpu.memory_space<vmem>>, vector<8x256xf32>,
    %c18_i32 = arith.constant 18 : i32
    %117 = tpu.dynamic_rotate %1 by %c18_i32 dim 1 : vector<8x256xf32>, i32 -> vector<8x256xf32>
    %c19 = arith.constant 19 : index
    %c0_63 = arith.constant 0 : index
    %c0_64 = arith.constant 0 : index
    %118 = vector.load %arg5[%c19, %c0_63, %c0_64] : memref<24x1x256xf32, #tpu.memory_space<vmem>>, vector<1x1x256xf32>
    %119 = vector.shape_cast %118 : vector<1x1x256xf32> to vector<1x256xf32>
    %120 = vector.broadcast %119 : vector<1x256xf32> to vector<8x256xf32>
    %121 = arith.mulf %117, %120 : vector<8x256xf32>
    %c152 = arith.constant 152 : index
    %c0_65 = arith.constant 0 : index
    %122 = vector.load %arg8[%c152, %c0_65] : memref<192x256xf32, #tpu.memory_space<vmem>>, vector<8x256xf32>
    tpu.vector_store %arg8[%c152, %c0_65], %121 {strides = array<i32>} : memref<192x256xf32, #tpu.memory_space<vmem>>, vector<8x256xf32>,
    %c238_i32 = arith.constant 238 : i32
    %123 = tpu.dynamic_rotate %1 by %c238_i32 dim 1 : vector<8x256xf32>, i32 -> vector<8x256xf32>
    %c20 = arith.constant 20 : index
    %c0_66 = arith.constant 0 : index
    %c0_67 = arith.constant 0 : index
    %124 = vector.load %arg5[%c20, %c0_66, %c0_67] : memref<24x1x256xf32, #tpu.memory_space<vmem>>, vector<1x1x256xf32>
    %125 = vector.shape_cast %124 : vector<1x1x256xf32> to vector<1x256xf32>
    %126 = vector.broadcast %125 : vector<1x256xf32> to vector<8x256xf32>
    %127 = arith.mulf %123, %126 : vector<8x256xf32>
    %c160 = arith.constant 160 : index
    %c0_68 = arith.constant 0 : index
    %128 = vector.load %arg8[%c160, %c0_68] : memref<192x256xf32, #tpu.memory_space<vmem>>, vector<8x256xf32>
    tpu.vector_store %arg8[%c160, %c0_68], %127 {strides = array<i32>} : memref<192x256xf32, #tpu.memory_space<vmem>>, vector<8x256xf32>,
    %c242_i32 = arith.constant 242 : i32
    %129 = tpu.dynamic_rotate %1 by %c242_i32 dim 1 : vector<8x256xf32>, i32 -> vector<8x256xf32>
    %c21 = arith.constant 21 : index
    %c0_69 = arith.constant 0 : index
    %c0_70 = arith.constant 0 : index
    %130 = vector.load %arg5[%c21, %c0_69, %c0_70] : memref<24x1x256xf32, #tpu.memory_space<vmem>>, vector<1x1x256xf32>
    %131 = vector.shape_cast %130 : vector<1x1x256xf32> to vector<1x256xf32>
    %132 = vector.broadcast %131 : vector<1x256xf32> to vector<8x256xf32>
    %133 = arith.mulf %129, %132 : vector<8x256xf32>
    %c168 = arith.constant 168 : index
    %c0_71 = arith.constant 0 : index
    %134 = vector.load %arg8[%c168, %c0_71] : memref<192x256xf32, #tpu.memory_space<vmem>>, vector<8x256xf32>
    tpu.vector_store %arg8[%c168, %c0_71], %133 {strides = array<i32>} : memref<192x256xf32, #tpu.memory_space<vmem>>, vector<8x256xf32>,
    %c224_i32 = arith.constant 224 : i32
    %135 = tpu.dynamic_rotate %1 by %c224_i32 dim 1 : vector<8x256xf32>, i32 -> vector<8x256xf32>
    %c22 = arith.constant 22 : index
    %c0_72 = arith.constant 0 : index
    %c0_73 = arith.constant 0 : index
    %136 = vector.load %arg5[%c22, %c0_72, %c0_73] : memref<24x1x256xf32, #tpu.memory_space<vmem>>, vector<1x1x256xf32>
    %137 = vector.shape_cast %136 : vector<1x1x256xf32> to vector<1x256xf32>
    %138 = vector.broadcast %137 : vector<1x256xf32> to vector<8x256xf32>
    %139 = arith.mulf %135, %138 : vector<8x256xf32>
    %c176 = arith.constant 176 : index
    %c0_74 = arith.constant 0 : index
    %140 = vector.load %arg8[%c176, %c0_74] : memref<192x256xf32, #tpu.memory_space<vmem>>, vector<8x256xf32>
    tpu.vector_store %arg8[%c176, %c0_74], %139 {strides = array<i32>} : memref<192x256xf32, #tpu.memory_space<vmem>>, vector<8x256xf32>,
    %c206_i32 = arith.constant 206 : i32
    %141 = tpu.dynamic_rotate %1 by %c206_i32 dim 1 : vector<8x256xf32>, i32 -> vector<8x256xf32>
    %c23 = arith.constant 23 : index
    %c0_75 = arith.constant 0 : index
    %c0_76 = arith.constant 0 : index
    %142 = vector.load %arg5[%c23, %c0_75, %c0_76] : memref<24x1x256xf32, #tpu.memory_space<vmem>>, vector<1x1x256xf32>
    %143 = vector.shape_cast %142 : vector<1x1x256xf32> to vector<1x256xf32>
    %144 = vector.broadcast %143 : vector<1x256xf32> to vector<8x256xf32>
    %145 = arith.mulf %141, %144 : vector<8x256xf32>
    %c184 = arith.constant 184 : index
    %c0_77 = arith.constant 0 : index
    %146 = vector.load %arg8[%c184, %c0_77] : memref<192x256xf32, #tpu.memory_space<vmem>>, vector<8x256xf32>
    tpu.vector_store %arg8[%c184, %c0_77], %145 {strides = array<i32>} : memref<192x256xf32, #tpu.memory_space<vmem>>, vector<8x256xf32>,
    %c0_78 = arith.constant 0 : index
    %c0_79 = arith.constant 0 : index
    %147 = vector.load %arg2[%c0_78, %c0_79] : memref<8x8xbf16, #tpu.memory_space<vmem>>, vector<8x8xbf16>
    %cst = arith.constant dense<0.000000e+00> : vector<8x256xf32>
    %148 = tpu.matmul %147, %2, %cst {dimension_numbers = #tpu.dot_dimension_numbers<[1], [0], [0], [1], [0, 0, 1, 1], [], []>} : vector<8x8xbf16>, vector<8x256xbf16>, vector<8x256xf32> -> vector<8x256xf32>
    %c0_80 = arith.constant 0 : index
    %c0_81 = arith.constant 0 : index
    %149 = vector.load %arg3[%c0_80, %c0_81] : memref<8x192xbf16, #tpu.memory_space<vmem>>, vector<8x192xbf16>
    %c0_82 = arith.constant 0 : index
    %c0_83 = arith.constant 0 : index
    %150 = vector.load %arg8[%c0_82, %c0_83] : memref<192x256xf32, #tpu.memory_space<vmem>>, vector<192x256xf32>
    %151 = arith.truncf %150 : vector<192x256xf32> to vector<192x256xbf16>
    %cst_84 = arith.constant dense<0.000000e+00> : vector<8x256xf32>
    %152 = tpu.matmul %149, %151, %cst_84 {dimension_numbers = #tpu.dot_dimension_numbers<[1], [0], [0], [1], [0, 0, 1, 1], [], []>} : vector<8x192xbf16>, vector<192x256xbf16>, vector<8x256xf32> -> vector<8x256xf32>
    %153 = arith.addf %148, %152 : vector<8x256xf32>
    %cst_85 = arith.constant dense<0.000000e+00> : vector<8xf32>
    %154 = vector.multi_reduction <add>, %1, %cst_85 [1] : vector<8x256xf32> to vector<8xf32>
    %155 = vector.shape_cast %154 : vector<8xf32> to vector<8x1xf32>
    %cst_86 = arith.constant 3.906250e-03 : f32
    %156 = vector.broadcast %cst_86 : f32 to vector<8x1xf32>
    %157 = arith.mulf %155, %156 : vector<8x1xf32>
    %c0_87 = arith.constant 0 : index
    %c0_88 = arith.constant 0 : index
    %158 = vector.load %arg4[%c0_87, %c0_88] : memref<8x8xf32, #tpu.memory_space<vmem>>, vector<8x8xf32>
    %cst_89 = arith.constant dense<0.000000e+00> : vector<8x1xf32>
    %159 = tpu.matmul %158, %157, %cst_89 {dimension_numbers = #tpu.dot_dimension_numbers<[1], [0], [0], [1], [0, 0, 1, 1], [], []>} : vector<8x8xf32>, vector<8x1xf32>, vector<8x1xf32> -> vector<8x1xf32>
    %c0_90 = arith.constant 0 : index
    %c0_91 = arith.constant 0 : index
    %160 = vector.load %arg6[%c0_90, %c0_91] : memref<8x1xf32, #tpu.memory_space<vmem>>, vector<8x1xf32>
    %161 = arith.addf %159, %160 : vector<8x1xf32>
    %162 = vector.broadcast %161 : vector<8x1xf32> to vector<8x256xf32>
    %163 = arith.addf %153, %162 : vector<8x256xf32>
    %c0_92 = arith.constant 0 : index
    %c0_93 = arith.constant 0 : index
    %c0_94 = arith.constant 0 : index
    %164 = vector.load %arg7[%c0_92, %c0_93, %c0_94] : memref<1x8x256xf32, #tpu.memory_space<vmem>>, vector<1x8x256xf32>
    %165 = vector.shape_cast %164 : vector<1x8x256xf32> to vector<8x256xf32>
    %166 = vector.shape_cast %163 : vector<8x256xf32> to vector<1x8x256xf32>
    tpu.vector_store %arg7[%c0_92, %c0_93, %c0_94], %166 {strides = array<i32>} : memref<1x8x256xf32, #tpu.memory_space<vmem>>, vector<1x8x256xf32>,
    return
  }
  func.func @transform_0(%arg0: i32) -> (i32, i32, i32) {
    %c0_i32 = arith.constant 0 : i32
    %c0_i32_0 = arith.constant 0 : i32
    %c0_i32_1 = arith.constant 0 : i32
    return %arg0, %c0_i32, %c0_i32_0 : i32, i32, i32
  }
  func.func @transform_1(%arg0: i32) -> (i32, i32) {
    %c0_i32 = arith.constant 0 : i32
    %c0_i32_0 = arith.constant 0 : i32
    %c0_i32_1 = arith.constant 0 : i32
    return %c0_i32, %c0_i32_0 : i32, i32
  }
  func.func @transform_2(%arg0: i32) -> (i32, i32) {
    %c0_i32 = arith.constant 0 : i32
    %c0_i32_0 = arith.constant 0 : i32
    %c0_i32_1 = arith.constant 0 : i32
    return %c0_i32, %c0_i32_0 : i32, i32
  }
  func.func @transform_3(%arg0: i32) -> (i32, i32) {
    %c0_i32 = arith.constant 0 : i32
    %c0_i32_0 = arith.constant 0 : i32
    %c0_i32_1 = arith.constant 0 : i32
    return %c0_i32, %c0_i32_0 : i32, i32
  }
  func.func @transform_4(%arg0: i32) -> (i32, i32, i32) {
    %c0_i32 = arith.constant 0 : i32
    %c0_i32_0 = arith.constant 0 : i32
    %c0_i32_1 = arith.constant 0 : i32
    %c0_i32_2 = arith.constant 0 : i32
    return %c0_i32, %c0_i32_0, %c0_i32_1 : i32, i32, i32
  }
  func.func @transform_5(%arg0: i32) -> (i32, i32) {
    %c0_i32 = arith.constant 0 : i32
    %c0_i32_0 = arith.constant 0 : i32
    %c0_i32_1 = arith.constant 0 : i32
    return %c0_i32, %c0_i32_0 : i32, i32
  }
  func.func @transform_6(%arg0: i32) -> (i32, i32, i32) {
    %c0_i32 = arith.constant 0 : i32
    %c0_i32_0 = arith.constant 0 : i32
    %c0_i32_1 = arith.constant 0 : i32
    return %arg0, %c0_i32, %c0_i32_0 : i32, i32, i32
  }
}

</mosaic_0001>

<bundles_post_ra>
// kernel: tpu_custom_call.1
= control target key start
LH: loop header
LB: loop body
LE: loop exit
PB: predicated region body
PF: predicated region fallthrough
CT: control target
= control target key end

     0   :  { %s1892_s0 = inlined_call_operand.hbm [shape: f32[2,8,256], index: 0, kind: input, shape index: {}]   ;;  %s1893_s1 = inlined_call_operand.vmem [shape: bf16[8,8], index: 1, kind: input, shape index: {}]   ;;  %s1894_s2 = inlined_call_operand.vmem [shape: bf16[8,192], index: 2, kind: input, shape index: {}]   ;;  %s1895_s3 = inlined_call_operand.hbm [shape: f32[8,8], index: 3, kind: input, shape index: {}]   ;;  %s1896_s4 = inlined_call_operand.hbm [shape: f32[24,1,256], index: 4, kind: input, shape index: {}]   ;;  %s1897_s5 = inlined_call_operand.vmem [shape: f32[8,1], index: 5, kind: input, shape index: {}]   ;;  %s1898_s6 = inlined_call_operand.hbm [shape: f32[2,8,256], index: 6, kind: output, shape index: {}]  }
   0x1   :  { %1903 = sst [smem:[#allocation13_spill]] %s1895_s3 }
   0x2   :  { %11 = vsyncpa [#allocation4], 0 }
   0x3   :  { %13 = vsyncpa [#allocation4 + $0x1], 0 }
   0x4   :  { %14 = vsyncpa [#allocation7], 0 }
   0x5   :  { %15 = vsyncpa [#allocation5], 0 }
   0x6   :  { %17 = vsyncpa [#allocation5 + $0x1], 0  ;;  %s1551_s21 = smov 0   ;;  %s1553_s22 = smov 0  }
   0x7   :  { %s1555_s23 = smov 0   ;;  %s1557_s24 = smov 0  }
   0x8 LB: > { %s1572_s25 = sadd.s32 4294967295, %s1486_s24   ;;  %s1211_s26 = sadd.s32 4294967294, %s1486_s24   ;;  %s1486_s24 = sphi %s1557_s24, %s1922_s24   ;;  %s1482_s23 = sphi %s1555_s23, %s1921_s23   ;;  %s1478_s22 = sphi %s1553_s22, %s1920_s22   ;;  %s1474_s21 = sphi %s1551_s21, %s1919_s21  }
   0x9   : > { %p43_p0 = scmp.ne.s32.totalorder %s1478_s22, %s1474_s21  ;;  %p1899_p1 = scmp.eq.s32.totalorder %s1572_s25, 0 }
   0xa   : > { %p178_p3 = scmp.eq.s32.totalorder %s1211_s26, 1  ;;  %p1212_p5 = scmp.ge.s32.totalorder %s1486_s24, 1 }
   0xb   : > { %p1581_p4 = por %p1899_p1, %p43_p0  ;;  %p185_p7 = scmp.lt.s32.totalorder %s1486_s24, 3 }
   0xc   : > { %p1586_p6 = por %p178_p3, %p43_p0  ;;  %s1488_s30 = smov [#allocation6]  }
   0xd   : > { %s1904_s27 = scalar_select %p1581_p4, 1, 0 }
   0xe   : > { %s1905_s28 = scalar_select %p1586_p6, 1, 0 }
   0xf   : > { %p1591_p8 = pnand %p1212_p5, %p185_p7  ;;  %s204_s7 = sshll.u32 %s1488_s30, 4  ;;  %s205_s7 = int_to_ptr.vmem [resolvable:$true] %s204_s7 }
  0x10   : > { %s1489_s8 = smov [#allocation8]   ;;  %s1349_s11 = scalar_lea.vmem %s205_s7, 128 }
  0x11   : > { %s1906_s29 = scalar_select %p1591_p8, 1, 0 }
  0x12   : > { %p1256_p10 = pneg %p1591_p8  ;;  %s214_s9 = sshll.u32 %s1489_s8, 4  ;;  %s215_s9 = int_to_ptr.vmem [resolvable:$true] %s214_s9 }
  0x13   : > { %p1350_p13 = scmp.ne.s32.totalorder %s205_s7, %s1349_s11  ;;  %p1357_p5 = scmp.lt.s32.totalorder %s205_s7, %s205_s7 }
  0x14   : > { %p1600_p11 = pnand %p1256_p10, %p1899_p1  ;;  %p1358_p7 = scmp.lt.s32.totalorder %s1349_s11, %s1349_s11 }
  0x16   : > { %p1340_p12 = pneg %p1600_p11  ;;  %p1359_p9 = por %p1358_p7, %p1357_p5 }
  0x18   : > { %p1352_p0 = pnand %p1350_p13, %p1340_p12 }
  0x1a   : > { %p1353_p3 = pneg %p1352_p0 }
  0x1c   : > { %p1360_p2 = pnand %p1359_p9, %p1353_p3 }
  0x1e   : > { %1363 = shalt.err (!%p1360_p2)
}
  0x1f   : > { %s1908_s3 = sld [smem:[#allocation13_spill]]  ;;  %s1375_s14 = scalar_lea.vmem %s215_s9, 768 }
  0x20   : > { %p1376_p10 = scmp.ne.s32.totalorder %s215_s9, %s1375_s14  ;;  %p1383_p13 = scmp.lt.s32.totalorder %s215_s9, %s215_s9 }
  0x21   : > { %p1384_p0 = scmp.lt.s32.totalorder %s1375_s14, %s1375_s14 }
  0x22   : > { %p1378_p1 = pnand %p1376_p10, %p1340_p12 }
  0x23   : > { %p1385_p4 = por %p1384_p0, %p1383_p13 }
  0x24   : > { %p1379_p6 = pneg %p1378_p1 }
  0x25   : > { %1259 = dma.hbm_to_vmem [thread:$0]  (!%p1600_p11), %s1908_s3, 128, %s205_s7, [#allocation7]  }
  0x26   : > { %p1386_p8 = pnand %p1385_p4, %p1379_p6 }
  0x28   : > { %1389 = shalt.err (!%p1386_p8)
}
  0x29   : > { %s1490_s15 = smov 32   ;;  %s1491_s16 = smov 2  }
  0x2a   : > { %1262 = dma.hbm_to_vmem [thread:$0]  (!%p1600_p11), %s1896_s4, 768, %s215_s9, [#allocation7], %s1490_s15, %s1490_s15, %s1491_s16  }
  0x2b   : > { %s1623_s19 = sadd.s32 1, %s1486_s24   ;;  %s30_s20 = sadd.s32 1, %s1482_s23 }
  0x2c   : > { %s27_s26 = ssub.s32 %s1486_s24, %s1623_s19  ;;  %p37_p1 = scmp.ne.s32.totalorder %s1482_s23, %s1478_s22 }
  0x2d   : > { %p28_p2 = scmp.eq.s32.totalorder %s27_s26, 0  ;;  %p38_p4 = scmp.eq.s32.totalorder %s1486_s24, 0 }
  0x2e   : > { %p1909_p6 = scmp.eq.s32.totalorder %s1572_s25, 1  ;;  %p1273_p9 = scmp.lt.s32.totalorder %s1486_s24, 2 }
  0x2f   : > { %s1639_s7 = scalar_select %p28_p2, %s1482_s23, %s30_s20  }
  0x30   : > { %p1633_p8 = por %p1909_p6, %p37_p1  ;;  %p39_p12 = por %p38_p4, %p37_p1 }
  0x31   : > { %s231_s8 = sand.u32 1, %s1482_s23   ;;  %s1235_s9 = sshll.u32 %s1486_s24, 8 }
  0x32   : > { %s1910_s30 = scalar_select %p1633_p8, 1, 0 }
  0x33   : > { %s1216_s10 = sshll.u32 %s231_s8, 4  ;;  %s1646_s13 = scalar_lea.hbm %s1892_s0, %s1235_s9 }
  0x34   : > { %s235_s14 = scalar_lea.vmem [#allocation3], %s1216_s10  ;;  %p1648_p11 = pnand %p1273_p9, %p39_p12 }
  0x35   : > { %s243_s15 = sshll.u32 %s235_s14, 4  ;;  %s232_s17 = scalar_lea.sflag [#allocation4], %s231_s8  ;;  %s244_s15 = int_to_ptr.vmem [resolvable:$true] %s243_s15 }
  0x36   : > { %s1390_s18 = scalar_lea.hbm %s1646_s13, 256  ;;  %p1392_p5 = pneg %p1648_p11 }
  0x37   : > { %p1391_p3 = scmp.ne.s32.totalorder %s1646_s13, %s1390_s18  ;;  %s1395_s9 = scalar_lea.hbm %s1892_s0, 512 }
  0x38   : > { %p1396_p13 = scmp.lt.s32.totalorder %s1646_s13, %s1892_s0  ;;  %p1397_p0 = scmp.lt.s32.totalorder %s1395_s9, %s1390_s18 }
  0x39   : > { %p1393_p7 = pnand %p1392_p5, %p1391_p3 }
  0x3a   : > { %p1398_p1 = por %p1397_p0, %p1396_p13 }
  0x3b   : > { %p1394_p10 = pneg %p1393_p7 }
  0x3d   : > { %p1399_p2 = pnand %p1398_p1, %p1394_p10 }
  0x3f   : > { %1402 = shalt.err (!%p1399_p2)
}
  0x40   : > { %s1403_s12 = scalar_lea.vmem %s244_s15, 256  ;;  %s1492_s8 = smov [#allocation3]  }
  0x41   : > { %p1404_p4 = scmp.ne.s32.totalorder %s244_s15, %s1403_s12  ;;  %s1408_s14 = sshll.u32 %s1492_s8, 4  ;;  %s1409_s14 = int_to_ptr.vmem [resolvable:$false] %s1408_s14 }
  0x42   : > { %s1410_s3 = scalar_lea.vmem %s1409_s14, 512  ;;  %p1411_p12 = scmp.lt.s32.totalorder %s244_s15, %s1409_s14 }
  0x43   : > { %p1406_p6 = pnand %p1404_p4, %p1392_p5  ;;  %p1412_p3 = scmp.lt.s32.totalorder %s1410_s3, %s1403_s12 }
  0x45   : > { %p1407_p9 = pneg %p1406_p6  ;;  %p1413_p7 = por %p1412_p3, %p1411_p12 }
  0x47   : > { %p1414_p8 = pnand %p1413_p7, %p1407_p9 }
  0x49   : > { %1417 = shalt.err (!%p1414_p8)
}
  0x4a   : > { %1266 = dma.hbm_to_vmem [thread:$0]  (!%p1648_p11), %s1646_s13, 256, %s244_s15, %s232_s17  }
  0x4b   : > { %p1912_p10 = scmp.ne.s32.totalorder %s1906_s29, 0 }
  0x4c   : > { %s1669_s18 = sand.u32 (!%p1912_p10), 1, %s1478_s22   ;;  %p1913_p5 = scmp.ne.s32.totalorder (!%p1912_p10), %s1904_s27, 0 }
  0x4d   : > { %252 = sbr.rel (%p1912_p10) target bundleno = 564 (0x234), region = 44  ;;  %s1220_s20 = sshll.u32 (!%p1912_p10), %s1669_s18, 4 }
  0x4e   : > { %s255_s26 = scalar_lea.sflag (!%p1912_p10), [#allocation4], %s1669_s18  ;;  %s258_s3 = scalar_lea.vmem (!%p1912_p10), [#allocation3], %s1220_s20 }
  0x52   : > { %1461 = dma.done.wait (%p1913_p5), %s255_s26, 256  }
  0x53   : > { %1463 = vsyncadd (%p1913_p5), %s255_s26, 4294967040  ;;  %p1914_p8 = scmp.eq.s32.totalorder %s1572_s25, 0 }
  0x55   : > { %1465 = dma.done.wait (%p1914_p8), [#allocation7], 896   ;;  %p1915_p11 = pmov %p1914_p8 }
  0x56   : > { %v1683_v0 = vld [vmem:[%s258_s3] sm:$0xff]  ;;  %v1685_v1 = vld [vmem:[%s258_s3 + $0x8] sm:$0xff]  ;;  %vm971_vm0 = vcmask 1043456   ;;  %v1493_v2 = vmov 0   ;;  %s1494_s29 = smov 64   ;;  %s1495_s27 = smov 52   ;;  %v304_v14 = vlaneseq }
  0x57   : > { %1467 = vsyncadd (%p1915_p11), [#allocation7], 4294966400  ;;  %1010 = vmatprep.mubr.bf16.mxu1 %v1493_v2  ;;  %1335 = vset.pattern.permute.xlu0 %v1493_v2  ;;  %v1019_v3 = vadd.f32 %v1685_v1, %v1683_v0  ;;  %v299_v4 = vpack.c.bf16 %v1685_v1, %v1685_v1  ;;  %v298_v5 = vpack.c.bf16 %v1683_v0, %v1683_v0  ;;  %v842_v7 = vld [vmem:[%s1893_s1] sm:$0xf]  ;;  %vm967_vm1 = vcmask 64512   ;;  %s1496_s16 = smov 76  }
  0x58   : > { %519 = vrot.lane.b32.xlu1 %v1685_v1, %s1494_s29  ;;  %v1497_v8 = vmov 0.0   ;;  %vm1498_vm2 = vmmov 0   ;;  %s1499_s17 = smov 116   ;;  %s1500_s9 = smov 12   ;;  %v1736_v9 = vld [vmem:[%s1894_s2] sm:$0xff]  ;;  %vm922_vm3 = vcmask 523264  }
  0x59   : > { %1020 = vadd.xlane.f32.xlu0 %v1019_v3  ;;  %1227 = vmatprep.subr.msk.bf16.mxu1 %vm971_vm0, %v299_v4  ;;  %v973_v6 = vsel %vm971_vm0, %v298_v5, 0  ;;  %s1501_s11 = smov 32   ;;  %s1502_s10 = smov 26   ;;  %v1225_v10 = vcombine.high %v1736_v9, %v1736_v9  ;;  %v312_v16 = vshrl.u32 %v304_v14, 7  ;;  %v1742_v18 = vand.u32 127, %v304_v14  ;;  %v1023_v38 = vld [vmem:[#allocation6] sm:$0xff] }
  0x5a   : > { %993 = vmatpush1.bf16.msra.mxu1 %v973_v6  ;;  %s1503_s12 = smov 122   ;;  %s1504_s8 = smov 38   ;;  %v648_v22 = vld [vmem:[#allocation8 + $0x1e] sm:$0x3]  ;;  %v614_v23 = vld [vmem:[#allocation8 + $0x1a] sm:$0x3] }
  0x5b   : > { %1239 = vmatprep.subr.mxu1 %v1497_v8  ;;  %s1505_s14 = smov 90   ;;  %s1506_s26 = smov 6   ;;  %1226 = vmatprep.mubr.msk.bf16.mxu0 %vm922_vm3, %v1225_v10  ;;  %v1744_v19 = vsub.s32 0, %v312_v16  ;;  %v1746_v20 = vsub.s32 1, %v312_v16  ;;  %vm545_vm4 = vcmp.lt.s32.totalorder %v1742_v18, 52  ;;  %vm497_vm5 = vcmp.lt.s32.totalorder %v1742_v18, 76 }
  0x5c   : > { %541 = vrot.lane.b32.xlu1 %v1683_v0, %s1495_s27  ;;  %s1507_s3 = smov 102   ;;  %s1510_s13 = smov 110   ;;  %v597_v24 = vld [vmem:[#allocation8 + $0x18] sm:$0x3]  ;;  %vm593_vm6 = vcmp.lt.s32.totalorder %v1742_v18, 116  ;;  %vm521_vm7 = vcmp.lt.s32.totalorder %v1742_v18, 64 }
  0x5d   : > { %1228 = vmatmul.mubr.msk.bf16.vlgmr.msra.gmra.mxu1 %vm967_vm1, %v842_v7  ;;  %s1511_s15 = smov 114   ;;  %v549_v25 = vld [vmem:[#allocation8 + $0x14] sm:$0x3]  ;;  %v653_v26 = vrot.slane %v648_v22, %v1744_v19  ;;  %v631_v28 = vld [vmem:[#allocation8 + $0x1c] sm:$0x3]  ;;  %v657_v29 = vrot.slane %v648_v22, %v1746_v20  ;;  %v623_v32 = vrot.slane %v614_v23, %v1746_v20  ;;  %v606_v34 = vrot.slane %v597_v24, %v1746_v20  ;;  %p1916_p0 = scmp.ne.s32.totalorder %s1910_s30, 0 }
  0x5e   : > { %1241 = vmatprep.mubr.msk.f32.mxu1 %vm1498_vm2, %v1497_v8  ;;  %v558_v39 = vrot.slane %v549_v25, %v1746_v20  ;;  %v501_v40 = vld [vmem:[#allocation8 + $0x10] sm:$0x3]  ;;  %v636_v41 = vrot.slane %v631_v28, %v1744_v19  ;;  %v640_v42 = vrot.slane %v631_v28, %v1746_v20  ;;  %v619_v44 = vrot.slane %v614_v23, %v1744_v19  ;;  %v573_v47 = vld [vmem:[#allocation8 + $0x16] sm:$0x3]  ;;  %v525_v53 = vld [vmem:[#allocation8 + $0x12] sm:$0x3] }
  0x5f   : > { %v602_v45 = vrot.slane %v597_v24, %v1744_v19  ;;  %v554_v55 = vrot.slane %v549_v25, %v1744_v19  ;;  %v510_v56 = vrot.slane %v501_v40, %v1746_v20  ;;  %vm569_vm8 = vcmp.lt.s32.totalorder %v1742_v18, 12 }
  0x60   : > { %543 = vrot.lane.b32.xlu1 %v1685_v1, %s1495_s27  ;;  %s1509_s27 = smov 78   ;;  %v582_v60 = vrot.slane %v573_v47, %v1746_v20  ;;  %vm449_vm9 = vcmp.lt.s32.totalorder %v1742_v18, 32  ;;  %vm473_vm10 = vcmp.lt.s32.totalorder %v1742_v18, 26  ;;  %vm401_vm11 = vcmp.lt.s32.totalorder %v1742_v18, 122 }
  0x61   : > { %vm425_vm12 = vcmp.lt.s32.totalorder %v1742_v18, 38  ;;  %vm353_vm13 = vcmp.lt.s32.totalorder %v1742_v18, 90  ;;  %vm377_vm14 = vcmp.lt.s32.totalorder %v1742_v18, 6  ;;  %vm306_vm15 = vcmp.lt.s32.totalorder %v1742_v18, 102 }
  0x62   : > { %vm329_vm0 = vcmp.lt.s32.totalorder %v1742_v18, 96  ;;  %vm757_vm2 = vcmp.lt.s32.totalorder %v1742_v18, 110  ;;  %vm781_vm3 = vcmp.lt.s32.totalorder %v1742_v18, 114 }
  0x64   : > { %493 = vrot.lane.b32.xlu1 %v1683_v0, %s1496_s16 }
  0x68   : > { %495 = vrot.lane.b32.xlu1 %v1685_v1, %s1496_s16  ;;  %s1512_s16 = smov 14  }
  0x6c   : > { %589 = vrot.lane.b32.xlu1 %v1683_v0, %s1499_s17 }
  0x6f   : > { %517 = vrot.lane.b32.xlu0 %v1683_v0, %s1494_s29  ;;  %s1508_s29 = smov 96  }
  0x70   : > { %591 = vrot.lane.b32.xlu1 %v1685_v1, %s1499_s17  ;;  %s1513_s17 = smov 18  }
  0x73   : > { %565 = vrot.lane.b32.xlu0 %v1683_v0, %s1500_s9 }
  0x74   : > { %567 = vrot.lane.b32.xlu1 %v1685_v1, %s1500_s9 }
  0x77   : > { %445 = vrot.lane.b32.xlu0 %v1683_v0, %s1501_s11 }
  0x78   : > { %447 = vrot.lane.b32.xlu1 %v1685_v1, %s1501_s11 }
  0x7b   : > { %469 = vrot.lane.b32.xlu0 %v1683_v0, %s1502_s10 }
  0x7c   : > { %471 = vrot.lane.b32.xlu1 %v1685_v1, %s1502_s10  ;;  %s1514_s10 = smov 50  }
  0x7f   : > { %397 = vrot.lane.b32.xlu0 %v1683_v0, %s1503_s12 }
  0x80   : > { %399 = vrot.lane.b32.xlu1 %v1685_v1, %s1503_s12 }
  0x83   : > { %421 = vrot.lane.b32.xlu0 %v1683_v0, %s1504_s8 }
  0x84   : > { %423 = vrot.lane.b32.xlu1 %v1685_v1, %s1504_s8 }
  0x87   : > { %349 = vrot.lane.b32.xlu0 %v1683_v0, %s1505_s14 }
  0x88   : > { %351 = vrot.lane.b32.xlu1 %v1685_v1, %s1505_s14  ;;  %s1236_s14 = sshll.u32 %s1572_s25, 8  ;;  %s1515_s25 = smov [#allocation9]  }
  0x8b   : > { %373 = vrot.lane.b32.xlu0 %v1683_v0, %s1506_s26 }
  0x8c   : > { %375 = vrot.lane.b32.xlu1 %v1685_v1, %s1506_s26  ;;  %s294_s26 = scalar_lea.vmem [#allocation9], %s1220_s20  ;;  %s1422_s20 = sshll.u32 %s1515_s25, 4  ;;  %s1423_s20 = int_to_ptr.vmem [resolvable:$false] %s1422_s20 }
  0x8f   : > { %300 = vrot.lane.b32.xlu0 %v1683_v0, %s1507_s3 }
  0x90   : > { %302 = vrot.lane.b32.xlu1 %v1685_v1, %s1507_s3  ;;  %s1122_s3 = sshll.u32 %s294_s26, 4  ;;  %s1123_s3 = int_to_ptr.vmem [resolvable:$true] %s1122_s3 }
  0x91   : > { %p1425_p4 = scmp.lt.s32.totalorder %s1123_s3, %s1423_s20 }
  0x93   : > { %325 = vrot.lane.b32.xlu0 %v1683_v0, %s1508_s29 }
  0x94   : > { %327 = vrot.lane.b32.xlu1 %v1685_v1, %s1508_s29 }
  0x97   : > { %818 = vrot.lane.b32.xlu0 %v1683_v0, %s1509_s27 }
  0x98   : > { %820 = vrot.lane.b32.xlu1 %v1685_v1, %s1509_s27 }
  0x9b   : > { %753 = vrot.lane.b32.xlu0 %v1683_v0, %s1510_s13 }
  0x9c   : > { %755 = vrot.lane.b32.xlu1 %v1685_v1, %s1510_s13  ;;  %s1855_s13 = scalar_lea.hbm %s1898_s6, %s1236_s14 }
  0x9f   : > { %777 = vrot.lane.b32.xlu0 %v1683_v0, %s1511_s15 }
  0xa0   : > { %779 = vrot.lane.b32.xlu1 %v1685_v1, %s1511_s15  ;;  %s1108_s15 = scalar_lea.sflag [#allocation5], %s1669_s18 }
  0xa3   : > { %705 = vrot.lane.b32.xlu0 %v1683_v0, %s1512_s16 }
  0xa4   : > { %707 = vrot.lane.b32.xlu1 %v1685_v1, %s1512_s16  ;;  %s1418_s16 = scalar_lea.vmem %s1123_s3, 256 }
  0xa5   : > { %p1419_p13 = scmp.ne.s32.totalorder %s1123_s3, %s1418_s16 }
  0xa7   : > { %729 = vrot.lane.b32.xlu0 %v1683_v0, %s1513_s17  ;;  %p1420_p1 = pnand %p1419_p13, %p1916_p0 }
  0xa8   : > { %731 = vrot.lane.b32.xlu1 %v1685_v1, %s1513_s17  ;;  %s1424_s17 = scalar_lea.vmem %s1423_s20, 512 }
  0xa9   : > { %p1421_p2 = pneg %p1420_p1  ;;  %p1426_p6 = scmp.lt.s32.totalorder %s1424_s17, %s1418_s16 }
  0xab   : > { %664 = vrot.lane.b32.xlu0 %v1683_v0, %s1514_s10  ;;  %v534_v0 = vrot.slane %v525_v53, %v1746_v20  ;;  %p1427_p9 = por %p1426_p6, %p1425_p4 }
  0xac   : > { %666 = vrot.lane.b32.xlu1 %v1685_v1, %s1514_s10  ;;  %v578_v1 = vrot.slane %v573_v47, %v1744_v19  ;;  %v429_v47 = vld [vmem:[#allocation8 + $0xa] sm:$0x3] }
  0xad   : > { %p1428_p12 = pnand %p1427_p9, %p1421_p2 }
  0xca   : > { %v520_v11 = vpop.permute.xlu1 %519 }
  0xce   : > { %v542_v12 = vpop.permute.xlu1 %541 }
  0xd2   : > { %v544_v13 = vpop.permute.xlu1 %543 }
  0xd3   : > { %v546_v30 = vsel %vm545_vm4, %v542_v12, %v544_v13  ;;  %v547_v31 = vsel %vm545_vm4, %v544_v13, %v542_v12  ;;  %v506_v12 = vrot.slane %v501_v40, %v1744_v19  ;;  %vm709_vm4 = vcmp.lt.s32.totalorder %v1742_v18, 14 }
  0xd4   : > { %v660_v43 = vmul.f32 %v653_v26, %v547_v31  ;;  %v661_v48 = vmul.f32 %v657_v29, %v546_v30  ;;  %v562_v3 = vmul.f32 %v558_v39, %v547_v31  ;;  %v561_v14 = vmul.f32 %v554_v55, %v546_v30 }
  0xd5   : > { %v434_v55 = vrot.slane %v429_v47, %v1744_v19 }
  0xd6   : > { %v494_v15 = vpop.permute.xlu1 %493 }
  0xda   : > { %v496_v17 = vpop.permute.xlu1 %495 }
  0xdb   : > { %v1757_v35 = vsel %vm497_vm5, %v494_v15, %v496_v17  ;;  %v499_v49 = vsel %vm497_vm5, %v496_v17, %v494_v15  ;;  %v530_v15 = vrot.slane %v525_v53, %v1744_v19  ;;  %vm733_vm5 = vcmp.lt.s32.totalorder %v1742_v18, 18 }
  0xdc   : > { %v627_v50 = vmul.f32 %v623_v32, %v1757_v35  ;;  %v626_v62 = vmul.f32 %v619_v44, %v499_v49  ;;  %v514_v23 = vmul.f32 %v510_v56, %v499_v49  ;;  %v513_v31 = vmul.f32 %v506_v12, %v1757_v35 }
  0xdd   : > { %v438_v56 = vrot.slane %v429_v47, %v1746_v20 }
  0xde   : > { %v590_v21 = vpop.permute.xlu1 %589 }
  0xe2   : > { %v592_v27 = vpop.permute.xlu1 %591  ;;  %v1021_v33 = vpop.xlane.xlu0 %1020 }
  0xe3   : > { %v1022_v36 = vmul.f32 0.00390625, %v1021_v33  ;;  %v595_v37 = vsel %vm593_vm6, %v592_v27, %v590_v21  ;;  %v594_v51 = vsel %vm593_vm6, %v590_v21, %v592_v27  ;;  %v477_v21 = vld [vmem:[#allocation8 + $0xe] sm:$0x3]  ;;  %vm668_vm6 = vcmp.lt.s32.totalorder %v1742_v18, 50 }
  0xe4   : > { %v610_v52 = vmul.f32 %v606_v34, %v595_v37  ;;  %v609_v63 = vmul.f32 %v602_v45, %v594_v51  ;;  %v486_v30 = vrot.slane %v477_v21, %v1746_v20  ;;  %v482_v33 = vrot.slane %v477_v21, %v1744_v19 }
  0xe5   : > { %1240 = vmatpush3.msra.mxu1 %v1022_v36 }
  0xe6   : > { %v568_v46 = vpop.permute.xlu1 %567  ;;  %v518_v54 = vpop.permute.xlu0 %517  ;;  %1242 = vmatmul.mubr.msk.f32.vlgmr.msra.gmra.mxu1 %vm967_vm1, %v1023_v38  ;;  %v905_v7 = vpack.c.bf16 %v627_v50, %v610_v52  ;;  %v904_v22 = vpack.c.bf16 %v626_v62, %v609_v63  ;;  %vm822_vm1 = vcmp.lt.s32.totalorder %v1742_v18, 78 }
  0xe7   : > { %v522_v57 = vsel %vm521_vm7, %v518_v54, %v520_v11  ;;  %v523_v58 = vsel %vm521_vm7, %v520_v11, %v518_v54  ;;  %v453_v11 = vld [vmem:[#allocation8 + $0xc] sm:$0x3] }
  0xe8   : > { %v643_v59 = vmul.f32 %v636_v41, %v523_v58  ;;  %v644_v61 = vmul.f32 %v640_v42, %v522_v57  ;;  %v538_v24 = vmul.f32 %v534_v0, %v523_v58  ;;  %v462_v25 = vrot.slane %v453_v11, %v1746_v20  ;;  %v357_v0 = vld [vmem:[#allocation8 + $0x4] sm:$0x3] }
  0xe9   : > { %v458_v29 = vrot.slane %v453_v11, %v1744_v19  ;;  %v537_v32 = vmul.f32 %v530_v15, %v522_v57 }
  0xea   : > { %v448_v2 = vpop.permute.xlu1 %447  ;;  %v566_v4 = vpop.permute.xlu0 %565  ;;  %v907_v5 = vpack.c.bf16 %v661_v48, %v644_v61  ;;  %v906_v6 = vpack.c.bf16 %v660_v43, %v643_v59  ;;  %v901_v40 = vpack.c.bf16 %v538_v24, %v514_v23  ;;  %v405_v43 = vld [vmem:[#allocation8 + $0x8] sm:$0x3]  ;;  %v309_v24 = vld [vmem:[#allocation8] sm:$0x3] }
  0xeb   : > { %v570_v8 = vsel %vm569_vm8, %v566_v4, %v568_v46  ;;  %v571_v10 = vsel %vm569_vm8, %v568_v46, %v566_v4  ;;  %v900_v48 = vpack.c.bf16 %v537_v32, %v513_v31  ;;  %v410_v49 = vrot.slane %v405_v43, %v1744_v19  ;;  %v381_v4 = vld [vmem:[#allocation8 + $0x6] sm:$0x3] }
  0xec   : > { %v586_v13 = vmul.f32 %v582_v60, %v570_v8  ;;  %926 = vmatprep.subr.bf16.mxu0 %v907_v5  ;;  %v585_v16 = vmul.f32 %v578_v1, %v571_v10  ;;  %v414_v50 = vrot.slane %v405_v43, %v1746_v20  ;;  %v362_v5 = vrot.slane %v357_v0, %v1744_v19  ;;  %v826_v43 = vld [vmem:[#allocation8 + $0x2e] sm:$0x3] }
  0xed   : > { %927 = vmatpush1.bf16.msra.mxu0 %v906_v6  ;;  %v366_v6 = vrot.slane %v357_v0, %v1746_v20  ;;  %v318_v31 = vrot.slane %v309_v24, %v1746_v20 }
  0xee   : > { %v472_v17 = vpop.permute.xlu1 %471  ;;  %v446_v26 = vpop.permute.xlu0 %445  ;;  %928 = vmatprep.subr.bf16.mxu0 %v905_v7  ;;  %v903_v27 = vpack.c.bf16 %v586_v13, %v562_v3  ;;  %v902_v36 = vpack.c.bf16 %v585_v16, %v561_v14  ;;  %v386_v13 = vrot.slane %v381_v4, %v1744_v19  ;;  %v390_v14 = vrot.slane %v381_v4, %v1746_v20 }
  0xef   : > { %v1789_v28 = vsel %vm449_vm9, %v448_v2, %v446_v26  ;;  %v1798_v37 = vsel %vm449_vm9, %v446_v26, %v448_v2 }
  0xf0   : > { %v466_v38 = vmul.f32 %v462_v25, %v1789_v28  ;;  %v465_v35 = vmul.f32 %v458_v29, %v1798_v37  ;;  %v333_v29 = vld [vmem:[#allocation8 + $0x2] sm:$0x3] }
  0xf1   : > { %929 = vmatpush1.bf16.msra.mxu0 %v904_v22 }
  0xf2   : > { %v400_v34 = vpop.permute.xlu1 %399  ;;  %v470_v39 = vpop.permute.xlu0 %469  ;;  %930 = vmatprep.subr.bf16.mxu0 %v903_v27 }
  0xf3   : > { %v474_v41 = vsel %vm473_vm10, %v470_v39, %v472_v17  ;;  %v475_v42 = vsel %vm473_vm10, %v472_v17, %v470_v39  ;;  %v802_v39 = vld [vmem:[#allocation8 + $0x2c] sm:$0x3] }
  0xf4   : > { %v490_v44 = vmul.f32 %v486_v30, %v475_v42  ;;  %v489_v45 = vmul.f32 %v482_v33, %v474_v41  ;;  %v314_v30 = vrot.slane %v309_v24, %v1744_v19  ;;  %v342_v41 = vrot.slane %v333_v29, %v1746_v20 }
  0xf5   : > { %931 = vmatpush1.bf16.msra.mxu0 %v902_v36 }
  0xf6   : > { %v424_v46 = vpop.permute.xlu1 %423  ;;  %v398_v51 = vpop.permute.xlu0 %397  ;;  %932 = vmatprep.subr.bf16.mxu0 %v901_v40  ;;  %v899_v52 = vpack.c.bf16 %v490_v44, %v466_v38  ;;  %v898_v58 = vpack.c.bf16 %v489_v45, %v465_v35  ;;  %v338_v40 = vrot.slane %v333_v29, %v1744_v19  ;;  %v807_v45 = vrot.slane %v802_v39, %v1744_v19 }
  0xf7   : > { %v402_v53 = vsel %vm401_vm11, %v398_v51, %v400_v34  ;;  %v403_v54 = vsel %vm401_vm11, %v400_v34, %v398_v51 }
  0xf8   : > { %v417_v59 = vmul.f32 %v410_v49, %v402_v53  ;;  %v418_v60 = vmul.f32 %v414_v50, %v403_v54  ;;  %v835_v53 = vrot.slane %v826_v43, %v1746_v20 }
  0xf9   : > { %933 = vmatpush1.bf16.msra.mxu0 %v900_v48 }
  0xfa   : > { %v352_v57 = vpop.permute.xlu1 %351  ;;  %v422_v61 = vpop.permute.xlu0 %421  ;;  %934 = vmatprep.subr.bf16.mxu0 %v899_v52  ;;  %v831_v52 = vrot.slane %v826_v43, %v1744_v19 }
  0xfb   : > { %v426_v62 = vsel %vm425_vm12, %v422_v61, %v424_v46  ;;  %v427_v63 = vsel %vm425_vm12, %v424_v46, %v422_v61  ;;  %v811_v46 = vrot.slane %v802_v39, %v1746_v20 }
  0xfc   : > { %v441_v1 = vmul.f32 %v434_v55, %v426_v62  ;;  %v442_v2 = vmul.f32 %v438_v56, %v427_v63  ;;  %v761_v62 = vld [vmem:[#allocation8 + $0x28] sm:$0x3] }
  0xfd   : > { %935 = vmatpush1.bf16.msra.mxu0 %v898_v58  ;;  %v770_v4 = vrot.slane %v761_v62, %v1746_v20 }
  0xfe   : > { %v376_v3 = vpop.permute.xlu1 %375  ;;  %v350_v7 = vpop.permute.xlu0 %349  ;;  %v897_v8 = vpack.c.bf16 %v442_v2, %v418_v60  ;;  %v896_v10 = vpack.c.bf16 %v441_v1, %v417_v59  ;;  %v785_v2 = vld [vmem:[#allocation8 + $0x2a] sm:$0x3] }
  0xff   : > { %v354_v11 = vsel %vm353_vm13, %v350_v7, %v352_v57  ;;  %v355_v12 = vsel %vm353_vm13, %v352_v57, %v350_v7 }
 0x100   : > { %936 = vmatprep.subr.bf16.mxu0 %v897_v8  ;;  %v369_v16 = vmul.f32 %v362_v5, %v355_v12  ;;  %v370_v17 = vmul.f32 %v366_v6, %v354_v11  ;;  %v790_v11 = vrot.slane %v785_v2, %v1744_v19  ;;  %v794_v12 = vrot.slane %v785_v2, %v1746_v20 }
 0x101   : > { %937 = vmatpush1.bf16.msra.mxu0 %v896_v10 }
 0x102   : > { %v303_v15 = vpop.permute.xlu1 %302  ;;  %v374_v21 = vpop.permute.xlu0 %373 }
 0x103   : > { %v378_v22 = vsel %vm377_vm14, %v374_v21, %v376_v3  ;;  %v379_v23 = vsel %vm377_vm14, %v376_v3, %v374_v21  ;;  %v766_v3 = vrot.slane %v761_v62, %v1744_v19 }
 0x104   : > { %v393_v25 = vmul.f32 %v386_v13, %v379_v23  ;;  %v394_v26 = vmul.f32 %v390_v14, %v378_v22  ;;  %v713_v22 = vld [vmem:[#allocation8 + $0x24] sm:$0x3] }
 0x106   : > { %v328_v27 = vpop.permute.xlu1 %327  ;;  %v301_v32 = vpop.permute.xlu0 %300  ;;  %v895_v33 = vpack.c.bf16 %v394_v26, %v370_v17  ;;  %v894_v34 = vpack.c.bf16 %v393_v25, %v369_v16  ;;  %v737_v25 = vld [vmem:[#allocation8 + $0x26] sm:$0x3]  ;;  %v718_v26 = vrot.slane %v713_v22, %v1744_v19 }
 0x107   : > { %v307_v36 = vsel %vm306_vm15, %v301_v32, %v303_v15  ;;  %v308_v38 = vsel %vm306_vm15, %v303_v15, %v301_v32  ;;  %v746_v39 = vrot.slane %v737_v25, %v1746_v20 }
 0x108   : > { %938 = vmatprep.subr.bf16.mxu0 %v895_v33  ;;  %v321_v44 = vmul.f32 %v314_v30, %v308_v38  ;;  %v322_v35 = vmul.f32 %v318_v31, %v307_v36  ;;  %v689_v33 = vld [vmem:[#allocation8 + $0x22] sm:$0x3]  ;;  %v742_v38 = vrot.slane %v737_v25, %v1744_v19 }
 0x109   : > { %939 = vmatpush1.bf16.msra.mxu0 %v894_v34 }
 0x10a   : > { %v821_v42 = vpop.permute.xlu1 %820  ;;  %v326_v47 = vpop.permute.xlu0 %325 }
 0x10b   : > { %v330_v48 = vsel %vm329_vm0, %v326_v47, %v328_v27  ;;  %v331_v49 = vsel %vm329_vm0, %v328_v27, %v326_v47  ;;  %v722_v27 = vrot.slane %v713_v22, %v1746_v20 }
 0x10c   : > { %v345_v50 = vmul.f32 %v338_v40, %v331_v49  ;;  %v346_v51 = vmul.f32 %v342_v41, %v330_v48  ;;  %v814_v55 = vmul.f32 %v807_v45, %v330_v48  ;;  %v815_v56 = vmul.f32 %v811_v46, %v331_v49  ;;  %v672_v40 = vld [vmem:[#allocation8 + $0x20] sm:$0x3] }
 0x10d   : > { %v694_v41 = vrot.slane %v689_v33, %v1744_v19 }
 0x10e   : > { %v756_v54 = vpop.permute.xlu1 %755  ;;  %v819_v57 = vpop.permute.xlu0 %818  ;;  %v893_v58 = vpack.c.bf16 %v346_v51, %v322_v35  ;;  %v892_v59 = vpack.c.bf16 %v345_v50, %v321_v44  ;;  %v677_v51 = vrot.slane %v672_v40, %v1744_v19 }
 0x10f   : > { %v823_v60 = vsel %vm822_vm1, %v819_v57, %v821_v42  ;;  %v824_v61 = vsel %vm822_vm1, %v821_v42, %v819_v57  ;;  %v698_v42 = vrot.slane %v689_v33, %v1746_v20 }
 0x110   : > { %v838_v63 = vmul.f32 %v831_v52, %v823_v60  ;;  %v839_v0 = vmul.f32 %v835_v53, %v824_v61  ;;  %940 = vmatprep.subr.bf16.mxu0 %v893_v58  ;;  %v681_v52 = vrot.slane %v672_v40, %v1746_v20 }
 0x111   : > { %941 = vmatpush1.bf16.msra.mxu0 %v892_v59 }
 0x112   : > { %v780_v1 = vpop.permute.xlu1 %779  ;;  %v754_v5 = vpop.permute.xlu0 %753  ;;  %v915_v6 = vpack.c.bf16 %v839_v0, %v815_v56  ;;  %v914_v7 = vpack.c.bf16 %v838_v63, %v814_v55  ;;  %v702_v55 = vmul.f32 %v698_v42, %v1798_v37  ;;  %v1024_v37 = vld [vmem:[%s1897_s5] sm:$0xff] }
 0x113   : > { %v758_v8 = vsel %vm757_vm2, %v754_v5, %v756_v54  ;;  %v759_v10 = vsel %vm757_vm2, %v756_v54, %v754_v5  ;;  %v701_v54 = vmul.f32 %v694_v41, %v1789_v28  ;;  %v1224_v28 = vcombine.low %v1736_v9, %v1736_v9 }
 0x114   : > { %950 = vmatprep.subr.bf16.mxu0 %v915_v6  ;;  %v773_v14 = vmul.f32 %v766_v3, %v758_v8  ;;  %v774_v15 = vmul.f32 %v770_v4, %v759_v10 }
 0x115   : > { %951 = vmatpush2.bf16.msra.mxu0 %v914_v7 }
 0x116   : > { %v708_v13 = vpop.permute.xlu1 %707  ;;  %v778_v16 = vpop.permute.xlu0 %777 }
 0x117   : > { %v782_v17 = vsel %vm781_vm3, %v778_v16, %v780_v1  ;;  %v783_v21 = vsel %vm781_vm3, %v780_v1, %v778_v16 }
 0x118   : > { %v797_v23 = vmul.f32 %v790_v11, %v782_v17  ;;  %v798_v24 = vmul.f32 %v794_v12, %v783_v21 }
 0x11a   : > { %v706_v29 = vpop.permute.xlu0 %705  ;;  %v732_v30 = vpop.permute.xlu1 %731  ;;  %v913_v31 = vpack.c.bf16 %v798_v24, %v774_v15  ;;  %v912_v32 = vpack.c.bf16 %v797_v23, %v773_v14 }
 0x11b   : > { %v710_v34 = vsel %vm709_vm4, %v706_v29, %v708_v13  ;;  %v711_v36 = vsel %vm709_vm4, %v708_v13, %v706_v29 }
 0x11c   : > { %952 = vmatprep.subr.bf16.mxu0 %v913_v31  ;;  %v725_v43 = vmul.f32 %v718_v26, %v711_v36  ;;  %v726_v44 = vmul.f32 %v722_v27, %v710_v34 }
 0x11d   : > { %953 = vmatpush2.bf16.msra.mxu0 %v912_v32  ;;  %v1012_v45 = vpop.f32.mrf.mxu1 }
 0x11e   : > { %v730_v35 = vpop.permute.xlu0 %729  ;;  %v667_v50 = vpop.permute.xlu1 %666 }
 0x11f   : > { %v734_v46 = vsel %vm733_vm5, %v730_v35, %v732_v30  ;;  %v735_v47 = vsel %vm733_vm5, %v732_v30, %v730_v35  ;;  %v1014_v53 = vpop.f32.mrf.mxu1 }
 0x120   : > { %v749_v48 = vmul.f32 %v742_v38, %v735_v47  ;;  %v750_v49 = vmul.f32 %v746_v39, %v734_v46 }
 0x121   : > { %v1016_v59 = vpop.f32.mrf.mxu1 }
 0x122   : > { %v665_v56 = vpop.permute.xlu0 %664  ;;  %v911_v57 = vpack.c.bf16 %v750_v49, %v726_v44  ;;  %v910_v58 = vpack.c.bf16 %v749_v48, %v725_v43 }
 0x123   : > { %v669_v60 = vsel %vm668_vm6, %v665_v56, %v667_v50  ;;  %v670_v61 = vsel %vm668_vm6, %v667_v50, %v665_v56  ;;  %v1017_v63 = vpop.f32.mrf.mxu1 }
 0x124   : > { %v684_v62 = vmul.f32 %v677_v51, %v670_v61  ;;  %v685_v18 = vmul.f32 %v681_v52, %v669_v60  ;;  %954 = vmatprep.subr.bf16.mxu0 %v911_v57 }
 0x125   : > { %955 = vmatpush2.bf16.msra.mxu0 %v910_v58 }
 0x126   : > { %v909_v19 = vpack.c.bf16 %v702_v55, %v685_v18  ;;  %v908_v20 = vpack.c.bf16 %v701_v54, %v684_v62 }
 0x128   : > { %956 = vmatprep.subr.bf16.mxu0 %v909_v19 }
 0x129   : > { %957 = vmatpush2.bf16.msra.mxu0 %v908_v20 }
 0x12c   : > { %959 = vmatmul.mubr.bf16.vlgmr.msra.gmra.mxu0 %v1224_v28 }
 0x1a6   : > { %v1094_v0 = vpop.f32.mrf.mxu1 }
 0x1a7   : > { %v1095_v1 = vadd.f32 %v1094_v0, %v1024_v37 }
 0x1a8   : > { %v1243_v2 = vpop.f32.mrf.mxu1 }
 0x1a9   : > { %1100 = vperm.xlu0 %1335, %v1095_v1  }
 0x1ec   : > { %v960_v3 = vpop.f32.mrf.mxu0 }
 0x1ed   : > { %v1013_v9 = vadd.f32 %v1012_v45, %v960_v3 }
 0x1ee   : > { %v962_v4 = vpop.f32.mrf.mxu0 }
 0x1ef   : > { %v1015_v7 = vadd.f32 %v1014_v53, %v962_v4 }
 0x1f0   : > { %v964_v5 = vpop.f32.mrf.mxu0 }
 0x1f2   : > { %v965_v6 = vpop.f32.mrf.mxu0 }
 0x224   : > { %v1101_v8 = vpop.permute.xlu0 %1100 }
 0x225   : > { %v1103_v10 = vadd.f32 %v1101_v8, %v1013_v9  ;;  %v1104_v11 = vadd.f32 %v1101_v8, %v1015_v7 }
 0x227   : > { %1105 = vst [vmem:[%s294_s26] sm:$0xff] %v1103_v10  ;;  %1106 = vst [vmem:[%s294_s26 + $0x8] sm:$0xff] %v1104_v11 }
 0x228   : > { %1431 = shalt.err (!%p1428_p12)
}
 0x229   : > { %s1432_s9 = scalar_lea.hbm %s1855_s13, 256  ;;  %s1436_s10 = scalar_lea.hbm %s1898_s6, 512 }
 0x22a   : > { %p1433_p3 = scmp.ne.s32.totalorder %s1855_s13, %s1432_s9  ;;  %p1437_p5 = scmp.lt.s32.totalorder %s1855_s13, %s1898_s6 }
 0x22b   : > { %p1438_p8 = scmp.lt.s32.totalorder %s1436_s10, %s1432_s9 }
 0x22c   : > { %p1434_p7 = pnand %p1433_p3, %p1916_p0 }
 0x22d   : > { %p1439_p11 = por %p1438_p8, %p1437_p5 }
 0x22e   : > { %p1435_p10 = pneg %p1434_p7 }
 0x230   : > { %p1440_p13 = pnand %p1439_p11, %p1435_p10 }
 0x232   : > { %1443 = shalt.err (!%p1440_p13)
}
 0x233   : > { %1254 = dma.vmem_to_hbm [thread:$0]  (%p1916_p0), %s1123_s3, 256, %s1855_s13, %s1108_s15  }
 0x234 PF: > { %s1134_s14 = sand.u32 1, %s1474_s21   ;;  %p1917_p1 = scmp.ne.s32.totalorder %s1905_s28, 0 }
 0x235   : > { %p1918_p2 = scmp.ge.s32.totalorder %s1486_s24, 2  ;;  %s1135_s26 = scalar_lea.sflag [#allocation5], %s1134_s14 }
 0x237   : > { %p1268_p4 = pnand %p1918_p2, %p1917_p1 }
 0x239   : > { %p1269_p6 = pneg %p1268_p4 }
 0x23b   : > { %1469 = dma.done.wait (%p1269_p6), %s1135_s26, 256  }
 0x23c   : > { %1471 = vsyncadd (%p1269_p6), %s1135_s26, 4294967040  ;;  %p20_p9 = scmp.ge.s32.totalorder %s1623_s19, 4   ;;  %s1919_s21 = smov %s1478_s22 }
 0x23d   : > { %s1920_s22 = smov %s1482_s23  ;;  %s1921_s23 = smov %s1639_s7 }
 0x23e   : > { %s1922_s24 = smov %s1623_s19  ;;  %22 = sbr.rel (!%p20_p9) target bundleno = 8 (0x8), region = 120 }
 0x243   :  { %1140 = vsyncpa [#allocation4], 1 }
 0x244   :  { %1142 = vsyncpa [#allocation4 + $0x1], 1 }
 0x245   :  { %1143 = vsyncpa [#allocation7], 1 }
 0x246   :  { %1144 = vsyncpa [#allocation5], 1 }
 0x247   :  { %1146 = vsyncpa [#allocation5 + $0x1], 1 }

// kernel: tpu_custom_call.1
= control target key start
LH: loop header
LB: loop body
LE: loop exit
PB: predicated region body
PF: predicated region fallthrough
CT: control target
= control target key end

     0   :  { %s1892_s0 = inlined_call_operand.hbm [shape: f32[2,8,256], index: 0, kind: input, shape index: {}]   ;;  %s1893_s1 = inlined_call_operand.vmem [shape: bf16[8,8], index: 1, kind: input, shape index: {}]   ;;  %s1894_s2 = inlined_call_operand.vmem [shape: bf16[8,192], index: 2, kind: input, shape index: {}]   ;;  %s1895_s3 = inlined_call_operand.hbm [shape: f32[8,8], index: 3, kind: input, shape index: {}]   ;;  %s1896_s4 = inlined_call_operand.hbm [shape: f32[24,1,256], index: 4, kind: input, shape index: {}]   ;;  %s1897_s5 = inlined_call_operand.vmem [shape: f32[8,1], index: 5, kind: input, shape index: {}]   ;;  %s1898_s6 = inlined_call_operand.hbm [shape: f32[2,8,256], index: 6, kind: output, shape index: {}]  }
   0x1   :  { %1903 = sst [smem:[#allocation13_spill]] %s1895_s3 }
   0x2   :  { %11 = vsyncpa [#allocation4], 0 }
   0x3   :  { %13 = vsyncpa [#allocation4 + $0x1], 0 }
   0x4   :  { %14 = vsyncpa [#allocation7], 0 }
   0x5   :  { %15 = vsyncpa [#allocation5], 0 }
   0x6   :  { %17 = vsyncpa [#allocation5 + $0x1], 0  ;;  %s1551_s21 = smov 0   ;;  %s1553_s22 = smov 0  }
   0x7   :  { %s1555_s23 = smov 0   ;;  %s1557_s24 = smov 0  }
   0x8 LB: > { %s1572_s25 = sadd.s32 4294967295, %s1486_s24   ;;  %s1211_s26 = sadd.s32 4294967294, %s1486_s24   ;;  %s1486_s24 = sphi %s1557_s24, %s1922_s24   ;;  %s1482_s23 = sphi %s1555_s23, %s1921_s23   ;;  %s1478_s22 = sphi %s1553_s22, %s1920_s22   ;;  %s1474_s21 = sphi %s1551_s21, %s1919_s21  }
   0x9   : > { %p43_p0 = scmp.ne.s32.totalorder %s1478_s22, %s1474_s21  ;;  %p1899_p1 = scmp.eq.s32.totalorder %s1572_s25, 0 }
   0xa   : > { %p178_p3 = scmp.eq.s32.totalorder %s1211_s26, 1  ;;  %p1212_p5 = scmp.ge.s32.totalorder %s1486_s24, 1 }
   0xb   : > { %p1581_p4 = por %p1899_p1, %p43_p0  ;;  %p185_p7 = scmp.lt.s32.totalorder %s1486_s24, 3 }
   0xc   : > { %p1586_p6 = por %p178_p3, %p43_p0  ;;  %s1488_s30 = smov [#allocation6]  }
   0xd   : > { %s1904_s27 = scalar_select %p1581_p4, 1, 0 }
   0xe   : > { %s1905_s28 = scalar_select %p1586_p6, 1, 0 }
   0xf   : > { %p1591_p8 = pnand %p1212_p5, %p185_p7  ;;  %s204_s7 = sshll.u32 %s1488_s30, 4  ;;  %s205_s7 = int_to_ptr.vmem [resolvable:$true] %s204_s7 }
  0x10   : > { %s1489_s8 = smov [#allocation8]   ;;  %s1349_s11 = scalar_lea.vmem %s205_s7, 128 }
  0x11   : > { %s1906_s29 = scalar_select %p1591_p8, 1, 0 }
  0x12   : > { %p1256_p10 = pneg %p1591_p8  ;;  %s214_s9 = sshll.u32 %s1489_s8, 4  ;;  %s215_s9 = int_to_ptr.vmem [resolvable:$true] %s214_s9 }
  0x13   : > { %p1350_p13 = scmp.ne.s32.totalorder %s205_s7, %s1349_s11  ;;  %p1357_p5 = scmp.lt.s32.totalorder %s205_s7, %s205_s7 }
  0x14   : > { %p1600_p11 = pnand %p1256_p10, %p1899_p1  ;;  %p1358_p7 = scmp.lt.s32.totalorder %s1349_s11, %s1349_s11 }
  0x16   : > { %p1340_p12 = pneg %p1600_p11  ;;  %p1359_p9 = por %p1358_p7, %p1357_p5 }
  0x18   : > { %p1352_p0 = pnand %p1350_p13, %p1340_p12 }
  0x1a   : > { %p1353_p3 = pneg %p1352_p0 }
  0x1c   : > { %p1360_p2 = pnand %p1359_p9, %p1353_p3 }
  0x1e   : > { %1363 = shalt.err (!%p1360_p2)
}
  0x1f   : > { %s1908_s3 = sld [smem:[#allocation13_spill]]  ;;  %s1375_s14 = scalar_lea.vmem %s215_s9, 768 }
  0x20   : > { %p1376_p10 = scmp.ne.s32.totalorder %s215_s9, %s1375_s14  ;;  %p1383_p13 = scmp.lt.s32.totalorder %s215_s9, %s215_s9 }
  0x21   : > { %p1384_p0 = scmp.lt.s32.totalorder %s1375_s14, %s1375_s14 }
  0x22   : > { %p1378_p1 = pnand %p1376_p10, %p1340_p12 }
  0x23   : > { %p1385_p4 = por %p1384_p0, %p1383_p13 }
  0x24   : > { %p1379_p6 = pneg %p1378_p1 }
  0x25   : > { %1259 = dma.hbm_to_vmem [thread:$0]  (!%p1600_p11), %s1908_s3, 128, %s205_s7, [#allocation7]  }
  0x26   : > { %p1386_p8 = pnand %p1385_p4, %p1379_p6 }
  0x28   : > { %1389 = shalt.err (!%p1386_p8)
}
  0x29   : > { %s1490_s15 = smov 32   ;;  %s1491_s16 = smov 2  }
  0x2a   : > { %1262 = dma.hbm_to_vmem [thread:$0]  (!%p1600_p11), %s1896_s4, 768, %s215_s9, [#allocation7], %s1490_s15, %s1490_s15, %s1491_s16  }
  0x2b   : > { %s1623_s19 = sadd.s32 1, %s1486_s24   ;;  %s30_s20 = sadd.s32 1, %s1482_s23 }
  0x2c   : > { %s27_s26 = ssub.s32 %s1486_s24, %s1623_s19  ;;  %p37_p1 = scmp.ne.s32.totalorder %s1482_s23, %s1478_s22 }
  0x2d   : > { %p28_p2 = scmp.eq.s32.totalorder %s27_s26, 0  ;;  %p38_p4 = scmp.eq.s32.totalorder %s1486_s24, 0 }
  0x2e   : > { %p1909_p6 = scmp.eq.s32.totalorder %s1572_s25, 1  ;;  %p1273_p9 = scmp.lt.s32.totalorder %s1486_s24, 2 }
  0x2f   : > { %s1639_s7 = scalar_select %p28_p2, %s1482_s23, %s30_s20  }
  0x30   : > { %p1633_p8 = por %p1909_p6, %p37_p1  ;;  %p39_p12 = por %p38_p4, %p37_p1 }
  0x31   : > { %s231_s8 = sand.u32 1, %s1482_s23   ;;  %s1235_s9 = sshll.u32 %s1486_s24, 8 }
  0x32   : > { %s1910_s30 = scalar_select %p1633_p8, 1, 0 }
  0x33   : > { %s1216_s10 = sshll.u32 %s231_s8, 4  ;;  %s1646_s13 = scalar_lea.hbm %s1892_s0, %s1235_s9 }
  0x34   : > { %s235_s14 = scalar_lea.vmem [#allocation3], %s1216_s10  ;;  %p1648_p11 = pnand %p1273_p9, %p39_p12 }
  0x35   : > { %s243_s15 = sshll.u32 %s235_s14, 4  ;;  %s232_s17 = scalar_lea.sflag [#allocation4], %s231_s8  ;;  %s244_s15 = int_to_ptr.vmem [resolvable:$true] %s243_s15 }
  0x36   : > { %s1390_s18 = scalar_lea.hbm %s1646_s13, 256  ;;  %p1392_p5 = pneg %p1648_p11 }
  0x37   : > { %p1391_p3 = scmp.ne.s32.totalorder %s1646_s13, %s1390_s18  ;;  %s1395_s9 = scalar_lea.hbm %s1892_s0, 512 }
  0x38   : > { %p1396_p13 = scmp.lt.s32.totalorder %s1646_s13, %s1892_s0  ;;  %p1397_p0 = scmp.lt.s32.totalorder %s1395_s9, %s1390_s18 }
  0x39   : > { %p1393_p7 = pnand %p1392_p5, %p1391_p3 }
  0x3a   : > { %p1398_p1 = por %p1397_p0, %p1396_p13 }
  0x3b   : > { %p1394_p10 = pneg %p1393_p7 }
  0x3d   : > { %p1399_p2 = pnand %p1398_p1, %p1394_p10 }
  0x3f   : > { %1402 = shalt.err (!%p1399_p2)
}
  0x40   : > { %s1403_s12 = scalar_lea.vmem %s244_s15, 256  ;;  %s1492_s8 = smov [#allocation3]  }
  0x41   : > { %p1404_p4 = scmp.ne.s32.totalorder %s244_s15, %s1403_s12  ;;  %s1408_s14 = sshll.u32 %s1492_s8, 4  ;;  %s1409_s14 = int_to_ptr.vmem [resolvable:$false] %s1408_s14 }
  0x42   : > { %s1410_s3 = scalar_lea.vmem %s1409_s14, 512  ;;  %p1411_p12 = scmp.lt.s32.totalorder %s244_s15, %s1409_s14 }
  0x43   : > { %p1406_p6 = pnand %p1404_p4, %p1392_p5  ;;  %p1412_p3 = scmp.lt.s32.totalorder %s1410_s3, %s1403_s12 }
  0x45   : > { %p1407_p9 = pneg %p1406_p6  ;;  %p1413_p7 = por %p1412_p3, %p1411_p12 }
  0x47   : > { %p1414_p8 = pnand %p1413_p7, %p1407_p9 }
  0x49   : > { %1417 = shalt.err (!%p1414_p8)
}
  0x4a   : > { %1266 = dma.hbm_to_vmem [thread:$0]  (!%p1648_p11), %s1646_s13, 256, %s244_s15, %s232_s17  }
  0x4b   : > { %p1912_p10 = scmp.ne.s32.totalorder %s1906_s29, 0 }
  0x4c   : > { %s1669_s18 = sand.u32 (!%p1912_p10), 1, %s1478_s22   ;;  %p1913_p5 = scmp.ne.s32.totalorder (!%p1912_p10), %s1904_s27, 0 }
  0x4d   : > { %252 = sbr.rel (%p1912_p10) target bundleno = 564 (0x234), region = 44  ;;  %s1220_s20 = sshll.u32 (!%p1912_p10), %s1669_s18, 4 }
  0x4e   : > { %s255_s26 = scalar_lea.sflag (!%p1912_p10), [#allocation4], %s1669_s18  ;;  %s258_s3 = scalar_lea.vmem (!%p1912_p10), [#allocation3], %s1220_s20 }
  0x52   : > { %1461 = dma.done.wait (%p1913_p5), %s255_s26, 256  }
  0x53   : > { %1463 = vsyncadd (%p1913_p5), %s255_s26, 4294967040  ;;  %p1914_p8 = scmp.eq.s32.totalorder %s1572_s25, 0 }
  0x55   : > { %1465 = dma.done.wait (%p1914_p8), [#allocation7], 896   ;;  %p1915_p11 = pmov %p1914_p8 }
  0x56   : > { %v1683_v0 = vld [vmem:[%s258_s3] sm:$0xff]  ;;  %v1685_v1 = vld [vmem:[%s258_s3 + $0x8] sm:$0xff]  ;;  %vm971_vm0 = vcmask 1043456   ;;  %v1493_v2 = vmov 0   ;;  %s1494_s29 = smov 64   ;;  %s1495_s27 = smov 52   ;;  %v304_v14 = vlaneseq }
  0x57   : > { %1467 = vsyncadd (%p1915_p11), [#allocation7], 4294966400  ;;  %1010 = vmatprep.mubr.bf16.mxu1 %v1493_v2  ;;  %1335 = vset.pattern.permute.xlu0 %v1493_v2  ;;  %v1019_v3 = vadd.f32 %v1685_v1, %v1683_v0  ;;  %v299_v4 = vpack.c.bf16 %v1685_v1, %v1685_v1  ;;  %v298_v5 = vpack.c.bf16 %v1683_v0, %v1683_v0  ;;  %v842_v7 = vld [vmem:[%s1893_s1] sm:$0xf]  ;;  %vm967_vm1 = vcmask 64512   ;;  %s1496_s16 = smov 76  }
  0x58   : > { %519 = vrot.lane.b32.xlu1 %v1685_v1, %s1494_s29  ;;  %v1497_v8 = vmov 0.0   ;;  %vm1498_vm2 = vmmov 0   ;;  %s1499_s17 = smov 116   ;;  %s1500_s9 = smov 12   ;;  %v1736_v9 = vld [vmem:[%s1894_s2] sm:$0xff]  ;;  %vm922_vm3 = vcmask 523264  }
  0x59   : > { %1020 = vadd.xlane.f32.xlu0 %v1019_v3  ;;  %1227 = vmatprep.subr.msk.bf16.mxu1 %vm971_vm0, %v299_v4  ;;  %v973_v6 = vsel %vm971_vm0, %v298_v5, 0  ;;  %s1501_s11 = smov 32   ;;  %s1502_s10 = smov 26   ;;  %v1225_v10 = vcombine.high %v1736_v9, %v1736_v9  ;;  %v312_v16 = vshrl.u32 %v304_v14, 7  ;;  %v1742_v18 = vand.u32 127, %v304_v14  ;;  %v1023_v38 = vld [vmem:[#allocation6] sm:$0xff] }
  0x5a   : > { %993 = vmatpush1.bf16.msra.mxu1 %v973_v6  ;;  %s1503_s12 = smov 122   ;;  %s1504_s8 = smov 38   ;;  %v648_v22 = vld [vmem:[#allocation8 + $0x1e] sm:$0x3]  ;;  %v614_v23 = vld [vmem:[#allocation8 + $0x1a] sm:$0x3] }
  0x5b   : > { %1239 = vmatprep.subr.mxu1 %v1497_v8  ;;  %s1505_s14 = smov 90   ;;  %s1506_s26 = smov 6   ;;  %1226 = vmatprep.mubr.msk.bf16.mxu0 %vm922_vm3, %v1225_v10  ;;  %v1744_v19 = vsub.s32 0, %v312_v16  ;;  %v1746_v20 = vsub.s32 1, %v312_v16  ;;  %vm545_vm4 = vcmp.lt.s32.totalorder %v1742_v18, 52  ;;  %vm497_vm5 = vcmp.lt.s32.totalorder %v1742_v18, 76 }
  0x5c   : > { %541 = vrot.lane.b32.xlu1 %v1683_v0, %s1495_s27  ;;  %s1507_s3 = smov 102   ;;  %s1510_s13 = smov 110   ;;  %v597_v24 = vld [vmem:[#allocation8 + $0x18] sm:$0x3]  ;;  %vm593_vm6 = vcmp.lt.s32.totalorder %v1742_v18, 116  ;;  %vm521_vm7 = vcmp.lt.s32.totalorder %v1742_v18, 64 }
  0x5d   : > { %1228 = vmatmul.mubr.msk.bf16.vlgmr.msra.gmra.mxu1 %vm967_vm1, %v842_v7  ;;  %s1511_s15 = smov 114   ;;  %v549_v25 = vld [vmem:[#allocation8 + $0x14] sm:$0x3]  ;;  %v653_v26 = vrot.slane %v648_v22, %v1744_v19  ;;  %v631_v28 = vld [vmem:[#allocation8 + $0x1c] sm:$0x3]  ;;  %v657_v29 = vrot.slane %v648_v22, %v1746_v20  ;;  %v623_v32 = vrot.slane %v614_v23, %v1746_v20  ;;  %v606_v34 = vrot.slane %v597_v24, %v1746_v20  ;;  %p1916_p0 = scmp.ne.s32.totalorder %s1910_s30, 0 }
  0x5e   : > { %1241 = vmatprep.mubr.msk.f32.mxu1 %vm1498_vm2, %v1497_v8  ;;  %v558_v39 = vrot.slane %v549_v25, %v1746_v20  ;;  %v501_v40 = vld [vmem:[#allocation8 + $0x10] sm:$0x3]  ;;  %v636_v41 = vrot.slane %v631_v28, %v1744_v19  ;;  %v640_v42 = vrot.slane %v631_v28, %v1746_v20  ;;  %v619_v44 = vrot.slane %v614_v23, %v1744_v19  ;;  %v573_v47 = vld [vmem:[#allocation8 + $0x16] sm:$0x3]  ;;  %v525_v53 = vld [vmem:[#allocation8 + $0x12] sm:$0x3] }
  0x5f   : > { %v602_v45 = vrot.slane %v597_v24, %v1744_v19  ;;  %v554_v55 = vrot.slane %v549_v25, %v1744_v19  ;;  %v510_v56 = vrot.slane %v501_v40, %v1746_v20  ;;  %vm569_vm8 = vcmp.lt.s32.totalorder %v1742_v18, 12 }
  0x60   : > { %543 = vrot.lane.b32.xlu1 %v1685_v1, %s1495_s27  ;;  %s1509_s27 = smov 78   ;;  %v582_v60 = vrot.slane %v573_v47, %v1746_v20  ;;  %vm449_vm9 = vcmp.lt.s32.totalorder %v1742_v18, 32  ;;  %vm473_vm10 = vcmp.lt.s32.totalorder %v1742_v18, 26  ;;  %vm401_vm11 = vcmp.lt.s32.totalorder %v1742_v18, 122 }
  0x61   : > { %vm425_vm12 = vcmp.lt.s32.totalorder %v1742_v18, 38  ;;  %vm353_vm13 = vcmp.lt.s32.totalorder %v1742_v18, 90  ;;  %vm377_vm14 = vcmp.lt.s32.totalorder %v1742_v18, 6  ;;  %vm306_vm15 = vcmp.lt.s32.totalorder %v1742_v18, 102 }
  0x62   : > { %vm329_vm0 = vcmp.lt.s32.totalorder %v1742_v18, 96  ;;  %vm757_vm2 = vcmp.lt.s32.totalorder %v1742_v18, 110  ;;  %vm781_vm3 = vcmp.lt.s32.totalorder %v1742_v18, 114 }
  0x64   : > { %493 = vrot.lane.b32.xlu1 %v1683_v0, %s1496_s16 }
  0x68   : > { %495 = vrot.lane.b32.xlu1 %v1685_v1, %s1496_s16  ;;  %s1512_s16 = smov 14  }
  0x6c   : > { %589 = vrot.lane.b32.xlu1 %v1683_v0, %s1499_s17 }
  0x6f   : > { %517 = vrot.lane.b32.xlu0 %v1683_v0, %s1494_s29  ;;  %s1508_s29 = smov 96  }
  0x70   : > { %591 = vrot.lane.b32.xlu1 %v1685_v1, %s1499_s17  ;;  %s1513_s17 = smov 18  }
  0x73   : > { %565 = vrot.lane.b32.xlu0 %v1683_v0, %s1500_s9 }
  0x74   : > { %567 = vrot.lane.b32.xlu1 %v1685_v1, %s1500_s9 }
  0x77   : > { %445 = vrot.lane.b32.xlu0 %v1683_v0, %s1501_s11 }
  0x78   : > { %447 = vrot.lane.b32.xlu1 %v1685_v1, %s1501_s11 }
  0x7b   : > { %469 = vrot.lane.b32.xlu0 %v1683_v0, %s1502_s10 }
  0x7c   : > { %471 = vrot.lane.b32.xlu1 %v1685_v1, %s1502_s10  ;;  %s1514_s10 = smov 50  }
  0x7f   : > { %397 = vrot.lane.b32.xlu0 %v1683_v0, %s1503_s12 }
  0x80   : > { %399 = vrot.lane.b32.xlu1 %v1685_v1, %s1503_s12 }
  0x83   : > { %421 = vrot.lane.b32.xlu0 %v1683_v0, %s1504_s8 }
  0x84   : > { %423 = vrot.lane.b32.xlu1 %v1685_v1, %s1504_s8 }
  0x87   : > { %349 = vrot.lane.b32.xlu0 %v1683_v0, %s1505_s14 }
  0x88   : > { %351 = vrot.lane.b32.xlu1 %v1685_v1, %s1505_s14  ;;  %s1236_s14 = sshll.u32 %s1572_s25, 8  ;;  %s1515_s25 = smov [#allocation9]  }
  0x8b   : > { %373 = vrot.lane.b32.xlu0 %v1683_v0, %s1506_s26 }
  0x8c   : > { %375 = vrot.lane.b32.xlu1 %v1685_v1, %s1506_s26  ;;  %s294_s26 = scalar_lea.vmem [#allocation9], %s1220_s20  ;;  %s1422_s20 = sshll.u32 %s1515_s25, 4  ;;  %s1423_s20 = int_to_ptr.vmem [resolvable:$false] %s1422_s20 }
  0x8f   : > { %300 = vrot.lane.b32.xlu0 %v1683_v0, %s1507_s3 }
  0x90   : > { %302 = vrot.lane.b32.xlu1 %v1685_v1, %s1507_s3  ;;  %s1122_s3 = sshll.u32 %s294_s26, 4  ;;  %s1123_s3 = int_to_ptr.vmem [resolvable:$true] %s1122_s3 }
  0x91   : > { %p1425_p4 = scmp.lt.s32.totalorder %s1123_s3, %s1423_s20 }
  0x93   : > { %325 = vrot.lane.b32.xlu0 %v1683_v0, %s1508_s29 }
  0x94   : > { %327 = vrot.lane.b32.xlu1 %v1685_v1, %s1508_s29 }
  0x97   : > { %818 = vrot.lane.b32.xlu0 %v1683_v0, %s1509_s27 }
  0x98   : > { %820 = vrot.lane.b32.xlu1 %v1685_v1, %s1509_s27 }
  0x9b   : > { %753 = vrot.lane.b32.xlu0 %v1683_v0, %s1510_s13 }
  0x9c   : > { %755 = vrot.lane.b32.xlu1 %v1685_v1, %s1510_s13  ;;  %s1855_s13 = scalar_lea.hbm %s1898_s6, %s1236_s14 }
  0x9f   : > { %777 = vrot.lane.b32.xlu0 %v1683_v0, %s1511_s15 }
  0xa0   : > { %779 = vrot.lane.b32.xlu1 %v1685_v1, %s1511_s15  ;;  %s1108_s15 = scalar_lea.sflag [#allocation5], %s1669_s18 }
  0xa3   : > { %705 = vrot.lane.b32.xlu0 %v1683_v0, %s1512_s16 }
  0xa4   : > { %707 = vrot.lane.b32.xlu1 %v1685_v1, %s1512_s16  ;;  %s1418_s16 = scalar_lea.vmem %s1123_s3, 256 }
  0xa5   : > { %p1419_p13 = scmp.ne.s32.totalorder %s1123_s3, %s1418_s16 }
  0xa7   : > { %729 = vrot.lane.b32.xlu0 %v1683_v0, %s1513_s17  ;;  %p1420_p1 = pnand %p1419_p13, %p1916_p0 }
  0xa8   : > { %731 = vrot.lane.b32.xlu1 %v1685_v1, %s1513_s17  ;;  %s1424_s17 = scalar_lea.vmem %s1423_s20, 512 }
  0xa9   : > { %p1421_p2 = pneg %p1420_p1  ;;  %p1426_p6 = scmp.lt.s32.totalorder %s1424_s17, %s1418_s16 }
  0xab   : > { %664 = vrot.lane.b32.xlu0 %v1683_v0, %s1514_s10  ;;  %v534_v0 = vrot.slane %v525_v53, %v1746_v20  ;;  %p1427_p9 = por %p1426_p6, %p1425_p4 }
  0xac   : > { %666 = vrot.lane.b32.xlu1 %v1685_v1, %s1514_s10  ;;  %v578_v1 = vrot.slane %v573_v47, %v1744_v19  ;;  %v429_v47 = vld [vmem:[#allocation8 + $0xa] sm:$0x3] }
  0xad   : > { %p1428_p12 = pnand %p1427_p9, %p1421_p2 }
  0xca   : > { %v520_v11 = vpop.permute.xlu1 %519 }
  0xce   : > { %v542_v12 = vpop.permute.xlu1 %541 }
  0xd2   : > { %v544_v13 = vpop.permute.xlu1 %543 }
  0xd3   : > { %v546_v30 = vsel %vm545_vm4, %v542_v12, %v544_v13  ;;  %v547_v31 = vsel %vm545_vm4, %v544_v13, %v542_v12  ;;  %v506_v12 = vrot.slane %v501_v40, %v1744_v19  ;;  %vm709_vm4 = vcmp.lt.s32.totalorder %v1742_v18, 14 }
  0xd4   : > { %v660_v43 = vmul.f32 %v653_v26, %v547_v31  ;;  %v661_v48 = vmul.f32 %v657_v29, %v546_v30  ;;  %v562_v3 = vmul.f32 %v558_v39, %v547_v31  ;;  %v561_v14 = vmul.f32 %v554_v55, %v546_v30 }
  0xd5   : > { %v434_v55 = vrot.slane %v429_v47, %v1744_v19 }
  0xd6   : > { %v494_v15 = vpop.permute.xlu1 %493 }
  0xda   : > { %v496_v17 = vpop.permute.xlu1 %495 }
  0xdb   : > { %v1757_v35 = vsel %vm497_vm5, %v494_v15, %v496_v17  ;;  %v499_v49 = vsel %vm497_vm5, %v496_v17, %v494_v15  ;;  %v530_v15 = vrot.slane %v525_v53, %v1744_v19  ;;  %vm733_vm5 = vcmp.lt.s32.totalorder %v1742_v18, 18 }
  0xdc   : > { %v627_v50 = vmul.f32 %v623_v32, %v1757_v35  ;;  %v626_v62 = vmul.f32 %v619_v44, %v499_v49  ;;  %v514_v23 = vmul.f32 %v510_v56, %v499_v49  ;;  %v513_v31 = vmul.f32 %v506_v12, %v1757_v35 }
  0xdd   : > { %v438_v56 = vrot.slane %v429_v47, %v1746_v20 }
  0xde   : > { %v590_v21 = vpop.permute.xlu1 %589 }
  0xe2   : > { %v592_v27 = vpop.permute.xlu1 %591  ;;  %v1021_v33 = vpop.xlane.xlu0 %1020 }
  0xe3   : > { %v1022_v36 = vmul.f32 0.00390625, %v1021_v33  ;;  %v595_v37 = vsel %vm593_vm6, %v592_v27, %v590_v21  ;;  %v594_v51 = vsel %vm593_vm6, %v590_v21, %v592_v27  ;;  %v477_v21 = vld [vmem:[#allocation8 + $0xe] sm:$0x3]  ;;  %vm668_vm6 = vcmp.lt.s32.totalorder %v1742_v18, 50 }
  0xe4   : > { %v610_v52 = vmul.f32 %v606_v34, %v595_v37  ;;  %v609_v63 = vmul.f32 %v602_v45, %v594_v51  ;;  %v486_v30 = vrot.slane %v477_v21, %v1746_v20  ;;  %v482_v33 = vrot.slane %v477_v21, %v1744_v19 }
  0xe5   : > { %1240 = vmatpush3.msra.mxu1 %v1022_v36 }
  0xe6   : > { %v568_v46 = vpop.permute.xlu1 %567  ;;  %v518_v54 = vpop.permute.xlu0 %517  ;;  %1242 = vmatmul.mubr.msk.f32.vlgmr.msra.gmra.mxu1 %vm967_vm1, %v1023_v38  ;;  %v905_v7 = vpack.c.bf16 %v627_v50, %v610_v52  ;;  %v904_v22 = vpack.c.bf16 %v626_v62, %v609_v63  ;;  %vm822_vm1 = vcmp.lt.s32.totalorder %v1742_v18, 78 }
  0xe7   : > { %v522_v57 = vsel %vm521_vm7, %v518_v54, %v520_v11  ;;  %v523_v58 = vsel %vm521_vm7, %v520_v11, %v518_v54  ;;  %v453_v11 = vld [vmem:[#allocation8 + $0xc] sm:$0x3] }
  0xe8   : > { %v643_v59 = vmul.f32 %v636_v41, %v523_v58  ;;  %v644_v61 = vmul.f32 %v640_v42, %v522_v57  ;;  %v538_v24 = vmul.f32 %v534_v0, %v523_v58  ;;  %v462_v25 = vrot.slane %v453_v11, %v1746_v20  ;;  %v357_v0 = vld [vmem:[#allocation8 + $0x4] sm:$0x3] }
  0xe9   : > { %v458_v29 = vrot.slane %v453_v11, %v1744_v19  ;;  %v537_v32 = vmul.f32 %v530_v15, %v522_v57 }
  0xea   : > { %v448_v2 = vpop.permute.xlu1 %447  ;;  %v566_v4 = vpop.permute.xlu0 %565  ;;  %v907_v5 = vpack.c.bf16 %v661_v48, %v644_v61  ;;  %v906_v6 = vpack.c.bf16 %v660_v43, %v643_v59  ;;  %v901_v40 = vpack.c.bf16 %v538_v24, %v514_v23  ;;  %v405_v43 = vld [vmem:[#allocation8 + $0x8] sm:$0x3]  ;;  %v309_v24 = vld [vmem:[#allocation8] sm:$0x3] }
  0xeb   : > { %v570_v8 = vsel %vm569_vm8, %v566_v4, %v568_v46  ;;  %v571_v10 = vsel %vm569_vm8, %v568_v46, %v566_v4  ;;  %v900_v48 = vpack.c.bf16 %v537_v32, %v513_v31  ;;  %v410_v49 = vrot.slane %v405_v43, %v1744_v19  ;;  %v381_v4 = vld [vmem:[#allocation8 + $0x6] sm:$0x3] }
  0xec   : > { %v586_v13 = vmul.f32 %v582_v60, %v570_v8  ;;  %926 = vmatprep.subr.bf16.mxu0 %v907_v5  ;;  %v585_v16 = vmul.f32 %v578_v1, %v571_v10  ;;  %v414_v50 = vrot.slane %v405_v43, %v1746_v20  ;;  %v362_v5 = vrot.slane %v357_v0, %v1744_v19  ;;  %v826_v43 = vld [vmem:[#allocation8 + $0x2e] sm:$0x3] }
  0xed   : > { %927 = vmatpush1.bf16.msra.mxu0 %v906_v6  ;;  %v366_v6 = vrot.slane %v357_v0, %v1746_v20  ;;  %v318_v31 = vrot.slane %v309_v24, %v1746_v20 }
  0xee   : > { %v472_v17 = vpop.permute.xlu1 %471  ;;  %v446_v26 = vpop.permute.xlu0 %445  ;;  %928 = vmatprep.subr.bf16.mxu0 %v905_v7  ;;  %v903_v27 = vpack.c.bf16 %v586_v13, %v562_v3  ;;  %v902_v36 = vpack.c.bf16 %v585_v16, %v561_v14  ;;  %v386_v13 = vrot.slane %v381_v4, %v1744_v19  ;;  %v390_v14 = vrot.slane %v381_v4, %v1746_v20 }
  0xef   : > { %v1789_v28 = vsel %vm449_vm9, %v448_v2, %v446_v26  ;;  %v1798_v37 = vsel %vm449_vm9, %v446_v26, %v448_v2 }
  0xf0   : > { %v466_v38 = vmul.f32 %v462_v25, %v1789_v28  ;;  %v465_v35 = vmul.f32 %v458_v29, %v1798_v37  ;;  %v333_v29 = vld [vmem:[#allocation8 + $0x2] sm:$0x3] }
  0xf1   : > { %929 = vmatpush1.bf16.msra.mxu0 %v904_v22 }
  0xf2   : > { %v400_v34 = vpop.permute.xlu1 %399  ;;  %v470_v39 = vpop.permute.xlu0 %469  ;;  %930 = vmatprep.subr.bf16.mxu0 %v903_v27 }
  0xf3   : > { %v474_v41 = vsel %vm473_vm10, %v470_v39, %v472_v17  ;;  %v475_v42 = vsel %vm473_vm10, %v472_v17, %v470_v39  ;;  %v802_v39 = vld [vmem:[#allocation8 + $0x2c] sm:$0x3] }
  0xf4   : > { %v490_v44 = vmul.f32 %v486_v30, %v475_v42  ;;  %v489_v45 = vmul.f32 %v482_v33, %v474_v41  ;;  %v314_v30 = vrot.slane %v309_v24, %v1744_v19  ;;  %v342_v41 = vrot.slane %v333_v29, %v1746_v20 }
  0xf5   : > { %931 = vmatpush1.bf16.msra.mxu0 %v902_v36 }
  0xf6   : > { %v424_v46 = vpop.permute.xlu1 %423  ;;  %v398_v51 = vpop.permute.xlu0 %397  ;;  %932 = vmatprep.subr.bf16.mxu0 %v901_v40  ;;  %v899_v52 = vpack.c.bf16 %v490_v44, %v466_v38  ;;  %v898_v58 = vpack.c.bf16 %v489_v45, %v465_v35  ;;  %v338_v40 = vrot.slane %v333_v29, %v1744_v19  ;;  %v807_v45 = vrot.slane %v802_v39, %v1744_v19 }
  0xf7   : > { %v402_v53 = vsel %vm401_vm11, %v398_v51, %v400_v34  ;;  %v403_v54 = vsel %vm401_vm11, %v400_v34, %v398_v51 }
  0xf8   : > { %v417_v59 = vmul.f32 %v410_v49, %v402_v53  ;;  %v418_v60 = vmul.f32 %v414_v50, %v403_v54  ;;  %v835_v53 = vrot.slane %v826_v43, %v1746_v20 }
  0xf9   : > { %933 = vmatpush1.bf16.msra.mxu0 %v900_v48 }
  0xfa   : > { %v352_v57 = vpop.permute.xlu1 %351  ;;  %v422_v61 = vpop.permute.xlu0 %421  ;;  %934 = vmatprep.subr.bf16.mxu0 %v899_v52  ;;  %v831_v52 = vrot.slane %v826_v43, %v1744_v19 }
  0xfb   : > { %v426_v62 = vsel %vm425_vm12, %v422_v61, %v424_v46  ;;  %v427_v63 = vsel %vm425_vm12, %v424_v46, %v422_v61  ;;  %v811_v46 = vrot.slane %v802_v39, %v1746_v20 }
  0xfc   : > { %v441_v1 = vmul.f32 %v434_v55, %v426_v62  ;;  %v442_v2 = vmul.f32 %v438_v56, %v427_v63  ;;  %v761_v62 = vld [vmem:[#allocation8 + $0x28] sm:$0x3] }
  0xfd   : > { %935 = vmatpush1.bf16.msra.mxu0 %v898_v58  ;;  %v770_v4 = vrot.slane %v761_v62, %v1746_v20 }
  0xfe   : > { %v376_v3 = vpop.permute.xlu1 %375  ;;  %v350_v7 = vpop.permute.xlu0 %349  ;;  %v897_v8 = vpack.c.bf16 %v442_v2, %v418_v60  ;;  %v896_v10 = vpack.c.bf16 %v441_v1, %v417_v59  ;;  %v785_v2 = vld [vmem:[#allocation8 + $0x2a] sm:$0x3] }
  0xff   : > { %v354_v11 = vsel %vm353_vm13, %v350_v7, %v352_v57  ;;  %v355_v12 = vsel %vm353_vm13, %v352_v57, %v350_v7 }
 0x100   : > { %936 = vmatprep.subr.bf16.mxu0 %v897_v8  ;;  %v369_v16 = vmul.f32 %v362_v5, %v355_v12  ;;  %v370_v17 = vmul.f32 %v366_v6, %v354_v11  ;;  %v790_v11 = vrot.slane %v785_v2, %v1744_v19  ;;  %v794_v12 = vrot.slane %v785_v2, %v1746_v20 }
 0x101   : > { %937 = vmatpush1.bf16.msra.mxu0 %v896_v10 }
 0x102   : > { %v303_v15 = vpop.permute.xlu1 %302  ;;  %v374_v21 = vpop.permute.xlu0 %373 }
 0x103   : > { %v378_v22 = vsel %vm377_vm14, %v374_v21, %v376_v3  ;;  %v379_v23 = vsel %vm377_vm14, %v376_v3, %v374_v21  ;;  %v766_v3 = vrot.slane %v761_v62, %v1744_v19 }
 0x104   : > { %v393_v25 = vmul.f32 %v386_v13, %v379_v23  ;;  %v394_v26 = vmul.f32 %v390_v14, %v378_v22  ;;  %v713_v22 = vld [vmem:[#allocation8 + $0x24] sm:$0x3] }
 0x106   : > { %v328_v27 = vpop.permute.xlu1 %327  ;;  %v301_v32 = vpop.permute.xlu0 %300  ;;  %v895_v33 = vpack.c.bf16 %v394_v26, %v370_v17  ;;  %v894_v34 = vpack.c.bf16 %v393_v25, %v369_v16  ;;  %v737_v25 = vld [vmem:[#allocation8 + $0x26] sm:$0x3]  ;;  %v718_v26 = vrot.slane %v713_v22, %v1744_v19 }
 0x107   : > { %v307_v36 = vsel %vm306_vm15, %v301_v32, %v303_v15  ;;  %v308_v38 = vsel %vm306_vm15, %v303_v15, %v301_v32  ;;  %v746_v39 = vrot.slane %v737_v25, %v1746_v20 }
 0x108   : > { %938 = vmatprep.subr.bf16.mxu0 %v895_v33  ;;  %v321_v44 = vmul.f32 %v314_v30, %v308_v38  ;;  %v322_v35 = vmul.f32 %v318_v31, %v307_v36  ;;  %v689_v33 = vld [vmem:[#allocation8 + $0x22] sm:$0x3]  ;;  %v742_v38 = vrot.slane %v737_v25, %v1744_v19 }
 0x109   : > { %939 = vmatpush1.bf16.msra.mxu0 %v894_v34 }
 0x10a   : > { %v821_v42 = vpop.permute.xlu1 %820  ;;  %v326_v47 = vpop.permute.xlu0 %325 }
 0x10b   : > { %v330_v48 = vsel %vm329_vm0, %v326_v47, %v328_v27  ;;  %v331_v49 = vsel %vm329_vm0, %v328_v27, %v326_v47  ;;  %v722_v27 = vrot.slane %v713_v22, %v1746_v20 }
 0x10c   : > { %v345_v50 = vmul.f32 %v338_v40, %v331_v49  ;;  %v346_v51 = vmul.f32 %v342_v41, %v330_v48  ;;  %v814_v55 = vmul.f32 %v807_v45, %v330_v48  ;;  %v815_v56 = vmul.f32 %v811_v46, %v331_v49  ;;  %v672_v40 = vld [vmem:[#allocation8 + $0x20] sm:$0x3] }
 0x10d   : > { %v694_v41 = vrot.slane %v689_v33, %v1744_v19 }
 0x10e   : > { %v756_v54 = vpop.permute.xlu1 %755  ;;  %v819_v57 = vpop.permute.xlu0 %818  ;;  %v893_v58 = vpack.c.bf16 %v346_v51, %v322_v35  ;;  %v892_v59 = vpack.c.bf16 %v345_v50, %v321_v44  ;;  %v677_v51 = vrot.slane %v672_v40, %v1744_v19 }
 0x10f   : > { %v823_v60 = vsel %vm822_vm1, %v819_v57, %v821_v42  ;;  %v824_v61 = vsel %vm822_vm1, %v821_v42, %v819_v57  ;;  %v698_v42 = vrot.slane %v689_v33, %v1746_v20 }
 0x110   : > { %v838_v63 = vmul.f32 %v831_v52, %v823_v60  ;;  %v839_v0 = vmul.f32 %v835_v53, %v824_v61  ;;  %940 = vmatprep.subr.bf16.mxu0 %v893_v58  ;;  %v681_v52 = vrot.slane %v672_v40, %v1746_v20 }
 0x111   : > { %941 = vmatpush1.bf16.msra.mxu0 %v892_v59 }
 0x112   : > { %v780_v1 = vpop.permute.xlu1 %779  ;;  %v754_v5 = vpop.permute.xlu0 %753  ;;  %v915_v6 = vpack.c.bf16 %v839_v0, %v815_v56  ;;  %v914_v7 = vpack.c.bf16 %v838_v63, %v814_v55  ;;  %v702_v55 = vmul.f32 %v698_v42, %v1798_v37  ;;  %v1024_v37 = vld [vmem:[%s1897_s5] sm:$0xff] }
 0x113   : > { %v758_v8 = vsel %vm757_vm2, %v754_v5, %v756_v54  ;;  %v759_v10 = vsel %vm757_vm2, %v756_v54, %v754_v5  ;;  %v701_v54 = vmul.f32 %v694_v41, %v1789_v28  ;;  %v1224_v28 = vcombine.low %v1736_v9, %v1736_v9 }
 0x114   : > { %950 = vmatprep.subr.bf16.mxu0 %v915_v6  ;;  %v773_v14 = vmul.f32 %v766_v3, %v758_v8  ;;  %v774_v15 = vmul.f32 %v770_v4, %v759_v10 }
 0x115   : > { %951 = vmatpush2.bf16.msra.mxu0 %v914_v7 }
 0x116   : > { %v708_v13 = vpop.permute.xlu1 %707  ;;  %v778_v16 = vpop.permute.xlu0 %777 }
 0x117   : > { %v782_v17 = vsel %vm781_vm3, %v778_v16, %v780_v1  ;;  %v783_v21 = vsel %vm781_vm3, %v780_v1, %v778_v16 }
 0x118   : > { %v797_v23 = vmul.f32 %v790_v11, %v782_v17  ;;  %v798_v24 = vmul.f32 %v794_v12, %v783_v21 }
 0x11a   : > { %v706_v29 = vpop.permute.xlu0 %705  ;;  %v732_v30 = vpop.permute.xlu1 %731  ;;  %v913_v31 = vpack.c.bf16 %v798_v24, %v774_v15  ;;  %v912_v32 = vpack.c.bf16 %v797_v23, %v773_v14 }
 0x11b   : > { %v710_v34 = vsel %vm709_vm4, %v706_v29, %v708_v13  ;;  %v711_v36 = vsel %vm709_vm4, %v708_v13, %v706_v29 }
 0x11c   : > { %952 = vmatprep.subr.bf16.mxu0 %v913_v31  ;;  %v725_v43 = vmul.f32 %v718_v26, %v711_v36  ;;  %v726_v44 = vmul.f32 %v722_v27, %v710_v34 }
 0x11d   : > { %953 = vmatpush2.bf16.msra.mxu0 %v912_v32  ;;  %v1012_v45 = vpop.f32.mrf.mxu1 }
 0x11e   : > { %v730_v35 = vpop.permute.xlu0 %729  ;;  %v667_v50 = vpop.permute.xlu1 %666 }
 0x11f   : > { %v734_v46 = vsel %vm733_vm5, %v730_v35, %v732_v30  ;;  %v735_v47 = vsel %vm733_vm5, %v732_v30, %v730_v35  ;;  %v1014_v53 = vpop.f32.mrf.mxu1 }
 0x120   : > { %v749_v48 = vmul.f32 %v742_v38, %v735_v47  ;;  %v750_v49 = vmul.f32 %v746_v39, %v734_v46 }
 0x121   : > { %v1016_v59 = vpop.f32.mrf.mxu1 }
 0x122   : > { %v665_v56 = vpop.permute.xlu0 %664  ;;  %v911_v57 = vpack.c.bf16 %v750_v49, %v726_v44  ;;  %v910_v58 = vpack.c.bf16 %v749_v48, %v725_v43 }
 0x123   : > { %v669_v60 = vsel %vm668_vm6, %v665_v56, %v667_v50  ;;  %v670_v61 = vsel %vm668_vm6, %v667_v50, %v665_v56  ;;  %v1017_v63 = vpop.f32.mrf.mxu1 }
 0x124   : > { %v684_v62 = vmul.f32 %v677_v51, %v670_v61  ;;  %v685_v18 = vmul.f32 %v681_v52, %v669_v60  ;;  %954 = vmatprep.subr.bf16.mxu0 %v911_v57 }
 0x125   : > { %955 = vmatpush2.bf16.msra.mxu0 %v910_v58 }
 0x126   : > { %v909_v19 = vpack.c.bf16 %v702_v55, %v685_v18  ;;  %v908_v20 = vpack.c.bf16 %v701_v54, %v684_v62 }
 0x128   : > { %956 = vmatprep.subr.bf16.mxu0 %v909_v19 }
 0x129   : > { %957 = vmatpush2.bf16.msra.mxu0 %v908_v20 }
 0x12c   : > { %959 = vmatmul.mubr.bf16.vlgmr.msra.gmra.mxu0 %v1224_v28 }
 0x1a6   : > { %v1094_v0 = vpop.f32.mrf.mxu1 }
 0x1a7   : > { %v1095_v1 = vadd.f32 %v1094_v0, %v1024_v37 }
 0x1a8   : > { %v1243_v2 = vpop.f32.mrf.mxu1 }
 0x1a9   : > { %1100 = vperm.xlu0 %1335, %v1095_v1  }
 0x1ec   : > { %v960_v3 = vpop.f32.mrf.mxu0 }
 0x1ed   : > { %v1013_v9 = vadd.f32 %v1012_v45, %v960_v3 }
 0x1ee   : > { %v962_v4 = vpop.f32.mrf.mxu0 }
 0x1ef   : > { %v1015_v7 = vadd.f32 %v1014_v53, %v962_v4 }
 0x1f0   : > { %v964_v5 = vpop.f32.mrf.mxu0 }
 0x1f2   : > { %v965_v6 = vpop.f32.mrf.mxu0 }
 0x224   : > { %v1101_v8 = vpop.permute.xlu0 %1100 }
 0x225   : > { %v1103_v10 = vadd.f32 %v1101_v8, %v1013_v9  ;;  %v1104_v11 = vadd.f32 %v1101_v8, %v1015_v7 }
 0x227   : > { %1105 = vst [vmem:[%s294_s26] sm:$0xff] %v1103_v10  ;;  %1106 = vst [vmem:[%s294_s26 + $0x8] sm:$0xff] %v1104_v11 }
 0x228   : > { %1431 = shalt.err (!%p1428_p12)
}
 0x229   : > { %s1432_s9 = scalar_lea.hbm %s1855_s13, 256  ;;  %s1436_s10 = scalar_lea.hbm %s1898_s6, 512 }
 0x22a   : > { %p1433_p3 = scmp.ne.s32.totalorder %s1855_s13, %s1432_s9  ;;  %p1437_p5 = scmp.lt.s32.totalorder %s1855_s13, %s1898_s6 }
 0x22b   : > { %p1438_p8 = scmp.lt.s32.totalorder %s1436_s10, %s1432_s9 }
 0x22c   : > { %p1434_p7 = pnand %p1433_p3, %p1916_p0 }
 0x22d   : > { %p1439_p11 = por %p1438_p8, %p1437_p5 }
 0x22e   : > { %p1435_p10 = pneg %p1434_p7 }
 0x230   : > { %p1440_p13 = pnand %p1439_p11, %p1435_p10 }
 0x232   : > { %1443 = shalt.err (!%p1440_p13)
}
 0x233   : > { %1254 = dma.vmem_to_hbm [thread:$0]  (%p1916_p0), %s1123_s3, 256, %s1855_s13, %s1108_s15  }
 0x234 PF: > { %s1134_s14 = sand.u32 1, %s1474_s21   ;;  %p1917_p1 = scmp.ne.s32.totalorder %s1905_s28, 0 }
 0x235   : > { %p1918_p2 = scmp.ge.s32.totalorder %s1486_s24, 2  ;;  %s1135_s26 = scalar_lea.sflag [#allocation5], %s1134_s14 }
 0x237   : > { %p1268_p4 = pnand %p1918_p2, %p1917_p1 }
 0x239   : > { %p1269_p6 = pneg %p1268_p4 }
 0x23b   : > { %1469 = dma.done.wait (%p1269_p6), %s1135_s26, 256  }
 0x23c   : > { %1471 = vsyncadd (%p1269_p6), %s1135_s26, 4294967040  ;;  %p20_p9 = scmp.ge.s32.totalorder %s1623_s19, 4   ;;  %s1919_s21 = smov %s1478_s22 }
 0x23d   : > { %s1920_s22 = smov %s1482_s23  ;;  %s1921_s23 = smov %s1639_s7 }
 0x23e   : > { %s1922_s24 = smov %s1623_s19  ;;  %22 = sbr.rel (!%p20_p9) target bundleno = 8 (0x8), region = 120 }
 0x243   :  { %1140 = vsyncpa [#allocation4], 1 }
 0x244   :  { %1142 = vsyncpa [#allocation4 + $0x1], 1 }
 0x245   :  { %1143 = vsyncpa [#allocation7], 1 }
 0x246   :  { %1144 = vsyncpa [#allocation5], 1 }
 0x247   :  { %1146 = vsyncpa [#allocation5 + $0x1], 1 }

</bundles_post_ra>
